<compile_context>
chip_gen: v6e
topology: v6e:2x2x1
jax: 0.10.0
libtpu: 0.0.40
codegen_flags: <defaults>
</compile_context>

<pallas_src>
import functools
import math

import jax
import jax.numpy as jnp
from jax import lax
from jax.experimental import pallas as pl
from jax.experimental.pallas import tpu as pltpu


def _layernorm(x, alpha, bias, eps, n):
    # torch: mean over last dim, std over last dim with Bessel correction (N-1), eps added to std.
    mean = jnp.sum(x, axis=-1, keepdims=True) * (1.0 / n)
    diff = x - mean
    var = jnp.sum(diff * diff, axis=-1, keepdims=True) * (1.0 / (n - 1))
    std = jnp.sqrt(var)
    # Exact reciprocal here: LN error multiplies the whole normalized activation.
    # The approx (EUP) reciprocal is kept only for the softmax denominator.
    return alpha * diff / (std + eps) + bias


def encoder_block_kernel(xf_ref, kmask_ref, wq_ref, wkv_ref, wo_ref,
                         w1_ref, b1_ref, w2_ref, b2_ref, ln_ref,
                         out_ref, kv_ref, *, h, d_k, tq, eps):
    bf = jnp.bfloat16
    f32 = jnp.float32
    D = h * d_k

    # Scalar LayerNorm params (torch.ones(1)-style), read from SMEM.
    ln0_a, ln0_b = ln_ref[0], ln_ref[1]
    ln1_a, ln1_b = ln_ref[2], ln_ref[3]

    # ---------- per-batch K/V projection: computed once (qi == 0), cached in bf16 VMEM ----------
    @pl.when(pl.program_id(1) == 0)
    def _():
        x_f = xf_ref[0]                                    # (S, D) f32, full sequence
        xn_f = _layernorm(x_f, ln0_a, ln0_b, eps, D)
        kv = jnp.dot(xn_f.astype(bf), wkv_ref[...], preferred_element_type=f32)   # (S, 2D)
        kv_ref[...] = kv.astype(bf)

    # ---------- query tile: sliced out of the VMEM-resident full-seq block (no extra DMA) ----------
    q_start = pl.multiple_of(pl.program_id(1) * tq, tq)
    x_q = xf_ref[0, pl.ds(q_start, tq), :]                 # (tq, D) f32, residual stream

    # O(S) key-padding predicate, broadcast over the query tile.
    # TODO(synk): a general dense (S,S) mask would need the old (tq,S) mask DMA path.
    msk = kmask_ref[0] == 0                                # (1, S) bool

    # ---------- residual connection 0: x + SelfAttention(LayerNorm(x)) ----------
    xn_q = _layernorm(x_q, ln0_a, ln0_b, eps, D)
    q = jnp.dot(xn_q.astype(bf), wq_ref[...], preferred_element_type=f32)         # (tq, D)
    q = q * (1.0 / math.sqrt(d_k))                         # scale folded into q once (f32)

    kv = kv_ref[...]                                       # (S, 2D) bf16 cache
    k = kv[:, :D]
    v = kv[:, D:]

    neg = jnp.float32(-1e9)
    attn = jnp.zeros((tq, D), f32)
    # TODO(synk): for lane-aligned head dims (d_k >= 128) replace this static per-head loop
    # with a single batched dot_general over a head axis (or a head grid axis) to fill the
    # MXU contraction dim; at d_k < 128 the reshape itself is the relayout, so the unrolled
    # loop (which lowers cleanly) is kept, with the wo projection accumulated per head so the
    # lane-dim concatenate disappears.
    for hd in range(h):
        sl = slice(hd * d_k, (hd + 1) * d_k)
        qh = q[:, sl].astype(bf)                           # (tq, d_k)
        # scores = qh @ kh.T  -> (tq, S), bf16 MXU inputs, f32 accumulation
        sc = lax.dot_general(qh, k[:, sl], (((1,), (1,)), ((), ())),
                             preferred_element_type=f32)
        sc = jnp.where(msk, neg, sc)
        # softmax along keys (f32 elementwise; denominator via approx reciprocal on the EUP)
        sc = sc - jnp.max(sc, axis=-1, keepdims=True)
        p = jnp.exp(sc)
        p = p * pl.reciprocal(jnp.sum(p, axis=-1, keepdims=True), approx=True)
        head = jnp.dot(p.astype(bf), v[:, sl], preferred_element_type=f32)         # (tq, d_k)
        # accumulate the output projection per head (no concatenate relayout)
        attn = attn + jnp.dot(head.astype(bf), wo_ref[sl, :], preferred_element_type=f32)

    x1 = x_q + attn                                        # dropout == identity

    # ---------- residual connection 1: x1 + FeedForward(LayerNorm(x1)) ----------
    # TODO(synk): for realistic D/d_ff on v7x (64 MiB VMEM) tile d_ff (inner emit_pipeline or a
    # reduction grid axis), set pipeline_mode=pl.Buffered(1) on the constant-index weight specs,
    # and stream K/V flash-style for long S so residency is bounded; also pad D/S to multiples
    # of 128 at real model dims so output stores are lane-dense.
    xn2 = _layernorm(x1, ln1_a, ln1_b, eps, D)
    hid = jnp.dot(xn2.astype(bf), w1_ref[...], preferred_element_type=f32) + b1_ref[0]
    hid = jnp.maximum(hid, 0.0)                            # relu (dropout == identity)
    ff = jnp.dot(hid.astype(bf), w2_ref[...], preferred_element_type=f32) + b2_ref[0]

    out_ref[0] = (x1 + ff).astype(out_ref.dtype)


def _chip_defaults():
    """Generation-aware query-tile size and VMEM limit."""
    kind = ""
    try:
        kind = jax.devices()[0].device_kind.lower()
    except Exception:
        pass
    if "v7" in kind:
        return 256, 48 * 1024 * 1024     # 64 MiB physical VMEM -> leave headroom
    if "v6" in kind:
        return 256, 100 * 1024 * 1024    # 256-wide MXU, 128 MiB physical VMEM
    if "v5" in kind:
        return 128, 100 * 1024 * 1024    # 128-wide MXU is already full at tq=128
    return 128, 48 * 1024 * 1024


def encoder_block(x, src_mask, params, *, h, eps=1e-6, tq=None):
    """x: (B, S, D) f32; src_mask: per-key padding mask, (B, 1, 1, S) or (B, S); params: f32 weights."""
    B, S, D = x.shape
    d_ff = params["w1"].shape[1]
    d_k = D // h

    tq_default, vmem_limit = _chip_defaults()
    if tq is None:
        tq = S if S <= tq_default else tq_default
    assert S % tq == 0, "S must be a multiple of the query tile size"
    nq = S // tq

    # O(S) key-padding mask instead of a dense O(S^2) mask.
    if src_mask.ndim == 4:
        kmask = src_mask[:, 0, 0, :]
    else:
        kmask = src_mask
    kmask = kmask.reshape(B, 1, S).astype(jnp.int32)

    bf = jnp.bfloat16
    wq = params["wq"].astype(bf)
    wkv = jnp.concatenate([params["wk"], params["wv"]], axis=1).astype(bf)   # (D, 2D) fused
    wo = params["wo"].astype(bf)
    w1 = params["w1"].astype(bf)
    w2 = params["w2"].astype(bf)
    b1 = params["b1"].reshape(1, d_ff).astype(jnp.float32)
    b2 = params["b2"].reshape(1, D).astype(jnp.float32)
    # [alpha0, bias0, alpha1, bias1] — scalar (torch.ones(1)) LayerNormalization params, SMEM-resident.
    ln = jnp.stack([params["ln0_alpha"], params["ln0_bias"],
                    params["ln1_alpha"], params["ln1_bias"]]).reshape(4).astype(jnp.float32)

    kernel = functools.partial(encoder_block_kernel, h=h, d_k=d_k, tq=tq, eps=eps)
    const = lambda shape: pl.BlockSpec(shape, lambda b, qi: (0, 0))

    # Advisory cost estimate so XLA schedules around the custom call.
    flops = 2 * B * S * D * (4 * D + 2 * d_ff + 2 * S)
    transcendentals = B * h * S * S + 4 * B * S
    bytes_accessed = (2 * B * S * D * 4                       # x in + out (f32)
                      + (2 * D * D + D * 2 * D + 2 * D * d_ff) * 2   # bf16 weights
                      + B * S * 4)                            # key mask

    return pl.pallas_call(
        kernel,
        out_shape=jax.ShapeDtypeStruct((B, S, D), x.dtype),
        grid_spec=pltpu.PrefetchScalarGridSpec(
            num_scalar_prefetch=0,
            grid=(B, nq),
            in_specs=[
                pl.BlockSpec((1, S, D), lambda b, qi: (b, 0, 0)),   # x (full seq; queries sliced in-kernel)
                pl.BlockSpec((1, 1, S), lambda b, qi: (b, 0, 0)),   # per-key padding mask (O(S))
                const((D, D)),                                      # wq
                const((D, 2 * D)),                                  # wkv (fused K,V)
                const((D, D)),                                      # wo
                const((D, d_ff)),                                   # w1
                const((1, d_ff)),                                   # b1
                const((d_ff, D)),                                   # w2
                const((1, D)),                                      # b2
                pl.BlockSpec(memory_space=pltpu.MemorySpace.SMEM),  # layernorm alpha/bias scalars
            ],
            out_specs=pl.BlockSpec((1, tq, D), lambda b, qi: (b, qi, 0)),
            scratch_shapes=[pltpu.VMEM((S, 2 * D), jnp.bfloat16)],  # per-batch K/V cache
        ),
        compiler_params=pltpu.CompilerParams(
            # B parallel (megacore), query-tile axis arbitrary (K/V cache carried across tiles).
            dimension_semantics=("parallel", "arbitrary"),
            vmem_limit_bytes=vmem_limit,
        ),
        cost_estimate=pl.CostEstimate(flops=flops, transcendentals=transcendentals,
                                      bytes_accessed=bytes_accessed),
    )(x, kmask, wq, wkv, wo, w1, b1, w2, b2, ln)


def encoder_block_ref(x, mask, p, *, h, eps=1e-6):
    """Pure-JAX f32 reference mirroring the PyTorch forward (mask: (B,1,1,S))."""
    B, S, D = x.shape
    d_k = D // h

    def ln(y, a, b):
        mean = y.mean(-1, keepdims=True)
        std = jnp.sqrt(((y - mean) ** 2).sum(-1, keepdims=True) / (D - 1))
        return a * (y - mean) / (std + eps) + b

    xn = ln(x, p["ln0_alpha"], p["ln0_bias"])
    q = xn @ p["wq"]; k = xn @ p["wk"]; v = xn @ p["wv"]
    qh = q.reshape(B, S, h, d_k).transpose(0, 2, 1, 3)
    kh = k.reshape(B, S, h, d_k).transpose(0, 2, 1, 3)
    vh = v.reshape(B, S, h, d_k).transpose(0, 2, 1, 3)
    sc = jnp.einsum("bhqd,bhkd->bhqk", qh, kh) / math.sqrt(d_k)
    sc = jnp.where(mask == 0, -1e9, sc)
    attn = jax.nn.softmax(sc, axis=-1)
    o = jnp.einsum("bhqk,bhkd->bhqd", attn, vh).transpose(0, 2, 1, 3).reshape(B, S, D)
    x1 = x + o @ p["wo"]
    xn2 = ln(x1, p["ln1_alpha"], p["ln1_bias"])
    ff = jnp.maximum(xn2 @ p["w1"] + p["b1"], 0.0) @ p["w2"] + p["b2"]
    return x1 + ff


if __name__ == "__main__":
    B, S, d_model, h, d_ff = 2, 8, 32, 4, 64

    key = jax.random.PRNGKey(0)
    keys = jax.random.split(key, 8)
    x = jax.random.normal(keys[0], (B, S, d_model), dtype=jnp.float32)

    # padding mask: batch 0 sees all 8 tokens, batch 1 sees only the first 6
    lens = jnp.array([S, S - 2])
    col = jnp.arange(S)[None, None, None, :]                      # (1,1,1,S)
    mask = (col < lens[:, None, None, None]).astype(jnp.int32)    # (B,1,1,S) key-padding mask

    s = 0.1
    params = {
        "wq": s * jax.random.normal(keys[1], (d_model, d_model), jnp.float32),
        "wk": s * jax.random.normal(keys[2], (d_model, d_model), jnp.float32),
        "wv": s * jax.random.normal(keys[3], (d_model, d_model), jnp.float32),
        "wo": s * jax.random.normal(keys[4], (d_model, d_model), jnp.float32),
        "w1": s * jax.random.normal(keys[5], (d_model, d_ff), jnp.float32),
        "b1": s * jax.random.normal(keys[6], (d_ff,), jnp.float32),
        "w2": s * jax.random.normal(keys[7], (d_ff, d_model), jnp.float32),
        "b2": jnp.zeros((d_model,), jnp.float32),
        # LayerNormalization params are torch.ones(1)
        "ln0_alpha": jnp.float32(1.0), "ln0_bias": jnp.float32(1.0),
        "ln1_alpha": jnp.float32(1.0), "ln1_bias": jnp.float32(1.0),
    }

    out = encoder_block(x, mask, params, h=h)
    out = jax.block_until_ready(out)

    with jax.default_matmul_precision("highest"):
        ref = encoder_block_ref(x, mask, params, h=h)
    assert out.shape == (B, S, d_model)
    # Tolerance loosened vs the f32 reference because the kernel uses bf16 MXU inputs
    # (f32 accumulation), a bf16 K/V cache, and an approx softmax reciprocal.
    assert jnp.allclose(out, ref, atol=3e-2, rtol=3e-2), (
        f"max abs err = {jnp.max(jnp.abs(out - ref))}")

    print("KERNEL_OK")
</pallas_src>

<mosaic_0001>
module attributes {stable_mosaic.version = 11 : i64} {
  func.func @encoder_block_kernel(%arg0: i32, %arg1: i32, %arg2: memref<1x8x32xf32, #tpu.memory_space<vmem>>, %arg3: memref<1x1x8xi32, #tpu.memory_space<vmem>>, %arg4: memref<32x32xbf16, #tpu.memory_space<vmem>>, %arg5: memref<32x64xbf16, #tpu.memory_space<vmem>>, %arg6: memref<32x32xbf16, #tpu.memory_space<vmem>>, %arg7: memref<32x64xbf16, #tpu.memory_space<vmem>>, %arg8: memref<1x64xf32, #tpu.memory_space<vmem>>, %arg9: memref<64x32xbf16, #tpu.memory_space<vmem>>, %arg10: memref<1x32xf32, #tpu.memory_space<vmem>>, %arg11: memref<4xf32, #tpu.memory_space<smem>>, %arg12: memref<1x8x32xf32, #tpu.memory_space<vmem>>, %arg13: memref<8x64xbf16, #tpu.memory_space<vmem>>) attributes {dimension_semantics = [#tpu.dimension_semantics<parallel>, #tpu.dimension_semantics<arbitrary>], iteration_bounds = array<i64: 2, 1>, scalar_prefetch = 0 : i64, scratch_operands = 1 : i64, tpu.core_type = #tpu.core_type<tc>, window_params = [{transform_indices = @transform_0, window_bounds = array<i64: 1, 8, 32>}, {transform_indices = @transform_1, window_bounds = array<i64: 1, 1, 8>}, {pipeline_mode = #tpu.pipeline_mode<synchronous>, transform_indices = @transform_2, window_bounds = array<i64: 32, 32>}, {pipeline_mode = #tpu.pipeline_mode<synchronous>, transform_indices = @transform_3, window_bounds = array<i64: 32, 64>}, {pipeline_mode = #tpu.pipeline_mode<synchronous>, transform_indices = @transform_4, window_bounds = array<i64: 32, 32>}, {pipeline_mode = #tpu.pipeline_mode<synchronous>, transform_indices = @transform_5, window_bounds = array<i64: 32, 64>}, {pipeline_mode = #tpu.pipeline_mode<synchronous>, transform_indices = @transform_6, window_bounds = array<i64: 1, 64>}, {pipeline_mode = #tpu.pipeline_mode<synchronous>, transform_indices = @transform_7, window_bounds = array<i64: 64, 32>}, {pipeline_mode = #tpu.pipeline_mode<synchronous>, transform_indices = @transform_8, window_bounds = array<i64: 1, 32>}, {transform_indices = @transform_9, window_bounds = array<i64: 4>}, {transform_indices = @transform_10, window_bounds = array<i64: 1, 8, 32>}]} {
    %c0 = arith.constant 0 : index
    %0 = memref.load %arg11[%c0] : memref<4xf32, #tpu.memory_space<smem>>
    %c1 = arith.constant 1 : index
    %1 = memref.load %arg11[%c1] : memref<4xf32, #tpu.memory_space<smem>>
    %c2 = arith.constant 2 : index
    %2 = memref.load %arg11[%c2] : memref<4xf32, #tpu.memory_space<smem>>
    %c3 = arith.constant 3 : index
    %3 = memref.load %arg11[%c3] : memref<4xf32, #tpu.memory_space<smem>>
    %c0_i32 = arith.constant 0 : i32
    %4 = arith.cmpi eq, %arg1, %c0_i32 : i32
    %5 = arith.extui %4 : i1 to i32
    %c0_i32_0 = arith.constant 0 : i32
    %6 = arith.cmpi ne, %5, %c0_i32_0 : i32
    scf.if %6 {
      %c0_66 = arith.constant 0 : index
      %c0_67 = arith.constant 0 : index
      %c0_68 = arith.constant 0 : index
      %188 = vector.load %arg2[%c0_66, %c0_67, %c0_68] : memref<1x8x32xf32, #tpu.memory_space<vmem>>, vector<1x8x32xf32>
      %189 = vector.shape_cast %188 : vector<1x8x32xf32> to vector<8x32xf32>
      %cst_69 = arith.constant dense<0.000000e+00> : vector<8xf32>
      %190 = vector.multi_reduction <add>, %189, %cst_69 [1] : vector<8x32xf32> to vector<8xf32>
      %191 = vector.shape_cast %190 : vector<8xf32> to vector<8x1xf32>
      %cst_70 = arith.constant 3.125000e-02 : f32
      %192 = vector.broadcast %cst_70 : f32 to vector<8x1xf32>
      %193 = arith.mulf %191, %192 : vector<8x1xf32>
      %194 = vector.broadcast %193 : vector<8x1xf32> to vector<8x32xf32>
      %195 = arith.subf %189, %194 : vector<8x32xf32>
      %196 = arith.mulf %195, %195 : vector<8x32xf32>
      %cst_71 = arith.constant dense<0.000000e+00> : vector<8xf32>
      %197 = vector.multi_reduction <add>, %196, %cst_71 [1] : vector<8x32xf32> to vector<8xf32>
      %198 = vector.shape_cast %197 : vector<8xf32> to vector<8x1xf32>
      %cst_72 = arith.constant 0.0322580636 : f32
      %199 = vector.broadcast %cst_72 : f32 to vector<8x1xf32>
      %200 = arith.mulf %198, %199 : vector<8x1xf32>
      %201 = math.sqrt %200 : vector<8x1xf32>
      %202 = vector.broadcast %0 : f32 to vector<8x32xf32>
      %203 = arith.mulf %202, %195 : vector<8x32xf32>
      %cst_73 = arith.constant 9.99999997E-7 : f32
      %204 = vector.broadcast %cst_73 : f32 to vector<8x1xf32>
      %205 = arith.addf %201, %204 : vector<8x1xf32>
      %206 = vector.broadcast %205 : vector<8x1xf32> to vector<8x32xf32>
      %207 = arith.divf %203, %206 : vector<8x32xf32>
      %208 = vector.broadcast %1 : f32 to vector<8x32xf32>
      %209 = arith.addf %207, %208 : vector<8x32xf32>
      %210 = arith.truncf %209 : vector<8x32xf32> to vector<8x32xbf16>
      %c0_74 = arith.constant 0 : index
      %c0_75 = arith.constant 0 : index
      %211 = vector.load %arg5[%c0_74, %c0_75] : memref<32x64xbf16, #tpu.memory_space<vmem>>, vector<32x64xbf16>
      %cst_76 = arith.constant dense<0.000000e+00> : vector<8x64xf32>
      %212 = tpu.matmul %210, %211, %cst_76 {dimension_numbers = #tpu.dot_dimension_numbers<[1], [0], [0], [1], [0, 0, 1, 1], [], []>} : vector<8x32xbf16>, vector<32x64xbf16>, vector<8x64xf32> -> vector<8x64xf32>
      %213 = arith.truncf %212 : vector<8x64xf32> to vector<8x64xbf16>
      %c0_77 = arith.constant 0 : index
      %c0_78 = arith.constant 0 : index
      %214 = vector.load %arg13[%c0_77, %c0_78] : memref<8x64xbf16, #tpu.memory_space<vmem>>, vector<8x64xbf16>
      tpu.vector_store %arg13[%c0_77, %c0_78], %213 {strides = array<i32>} : memref<8x64xbf16, #tpu.memory_space<vmem>>, vector<8x64xbf16>,
    } else {
    }
    %c8_i32 = arith.constant 8 : i32
    %7 = arith.muli %arg1, %c8_i32 : i32
    %8 = tpu.assume_multiple %7, 8 : i32
    %c0_1 = arith.constant 0 : index
    %9 = arith.index_cast %8 : i32 to index
    %c0_2 = arith.constant 0 : index
    %10 = vector.load %arg2[%c0_1, %9, %c0_2] : memref<1x8x32xf32, #tpu.memory_space<vmem>>, vector<1x8x32xf32>
    %11 = vector.shape_cast %10 : vector<1x8x32xf32> to vector<8x32xf32>
    %c0_3 = arith.constant 0 : index
    %c0_4 = arith.constant 0 : index
    %c0_5 = arith.constant 0 : index
    %12 = vector.load %arg3[%c0_3, %c0_4, %c0_5] : memref<1x1x8xi32, #tpu.memory_space<vmem>>, vector<1x1x8xi32>
    %13 = vector.shape_cast %12 : vector<1x1x8xi32> to vector<1x8xi32>
    %c0_i32_6 = arith.constant 0 : i32
    %14 = vector.broadcast %c0_i32_6 : i32 to vector<1x8xi32>
    %15 = arith.cmpi eq, %13, %14 : vector<1x8xi32>
    %cst = arith.constant dense<0.000000e+00> : vector<8xf32>
    %16 = vector.multi_reduction <add>, %11, %cst [1] : vector<8x32xf32> to vector<8xf32>
    %17 = vector.shape_cast %16 : vector<8xf32> to vector<8x1xf32>
    %cst_7 = arith.constant 3.125000e-02 : f32
    %18 = vector.broadcast %cst_7 : f32 to vector<8x1xf32>
    %19 = arith.mulf %17, %18 : vector<8x1xf32>
    %20 = vector.broadcast %19 : vector<8x1xf32> to vector<8x32xf32>
    %21 = arith.subf %11, %20 : vector<8x32xf32>
    %22 = arith.mulf %21, %21 : vector<8x32xf32>
    %cst_8 = arith.constant dense<0.000000e+00> : vector<8xf32>
    %23 = vector.multi_reduction <add>, %22, %cst_8 [1] : vector<8x32xf32> to vector<8xf32>
    %24 = vector.shape_cast %23 : vector<8xf32> to vector<8x1xf32>
    %cst_9 = arith.constant 0.0322580636 : f32
    %25 = vector.broadcast %cst_9 : f32 to vector<8x1xf32>
    %26 = arith.mulf %24, %25 : vector<8x1xf32>
    %27 = math.sqrt %26 : vector<8x1xf32>
    %28 = vector.broadcast %0 : f32 to vector<8x32xf32>
    %29 = arith.mulf %28, %21 : vector<8x32xf32>
    %cst_10 = arith.constant 9.99999997E-7 : f32
    %30 = vector.broadcast %cst_10 : f32 to vector<8x1xf32>
    %31 = arith.addf %27, %30 : vector<8x1xf32>
    %32 = vector.broadcast %31 : vector<8x1xf32> to vector<8x32xf32>
    %33 = arith.divf %29, %32 : vector<8x32xf32>
    %34 = vector.broadcast %1 : f32 to vector<8x32xf32>
    %35 = arith.addf %33, %34 : vector<8x32xf32>
    %36 = arith.truncf %35 : vector<8x32xf32> to vector<8x32xbf16>
    %c0_11 = arith.constant 0 : index
    %c0_12 = arith.constant 0 : index
    %37 = vector.load %arg4[%c0_11, %c0_12] : memref<32x32xbf16, #tpu.memory_space<vmem>>, vector<32x32xbf16>
    %cst_13 = arith.constant dense<0.000000e+00> : vector<8x32xf32>
    %38 = tpu.matmul %36, %37, %cst_13 {dimension_numbers = #tpu.dot_dimension_numbers<[1], [0], [0], [1], [0, 0, 1, 1], [], []>} : vector<8x32xbf16>, vector<32x32xbf16>, vector<8x32xf32> -> vector<8x32xf32>
    %cst_14 = arith.constant 0.353553385 : f32
    %39 = vector.broadcast %cst_14 : f32 to vector<8x32xf32>
    %40 = arith.mulf %38, %39 : vector<8x32xf32>
    %c0_15 = arith.constant 0 : index
    %c0_16 = arith.constant 0 : index
    %41 = vector.load %arg13[%c0_15, %c0_16] : memref<8x64xbf16, #tpu.memory_space<vmem>>, vector<8x64xbf16>
    %42 = vector.extract_strided_slice %41 {offsets = [0, 0], sizes = [8, 32], strides = [1, 1]} : vector<8x64xbf16> to vector<8x32xbf16>
    %43 = vector.extract_strided_slice %41 {offsets = [0, 32], sizes = [8, 32], strides = [1, 1]} : vector<8x64xbf16> to vector<8x32xbf16>
    %cst_17 = arith.constant 0.000000e+00 : f32
    %44 = vector.broadcast %cst_17 : f32 to vector<8x32xf32>
    %45 = vector.extract_strided_slice %40 {offsets = [0, 0], sizes = [8, 8], strides = [1, 1]} : vector<8x32xf32> to vector<8x8xf32>
    %46 = arith.truncf %45 : vector<8x8xf32> to vector<8x8xbf16>
    %47 = vector.extract_strided_slice %42 {offsets = [0, 0], sizes = [8, 8], strides = [1, 1]} : vector<8x32xbf16> to vector<8x8xbf16>
    %cst_18 = arith.constant dense<0.000000e+00> : vector<8x8xf32>
    %48 = tpu.matmul %46, %47, %cst_18 {dimension_numbers = #tpu.dot_dimension_numbers<[1], [1], [0], [0], [0, 0, 1, 0], [], []>} : vector<8x8xbf16>, vector<8x8xbf16>, vector<8x8xf32> -> vector<8x8xf32>
    %cst_19 = arith.constant -1.000000e+09 : f32
    %49 = vector.shape_cast %15 : vector<1x8xi1> to vector<1x8xi1>
    %50 = vector.broadcast %49 : vector<1x8xi1> to vector<8x8xi1>
    %51 = vector.broadcast %cst_19 : f32 to vector<8x8xf32>
    %52 = arith.select %50, %51, %48 : vector<8x8xi1>, vector<8x8xf32>
    %cst_20 = arith.constant dense<0xFF800000> : vector<8xf32>
    %53 = vector.multi_reduction <maximumf>, %52, %cst_20 [1] : vector<8x8xf32> to vector<8xf32>
    %54 = vector.shape_cast %53 : vector<8xf32> to vector<8x1xf32>
    %55 = vector.broadcast %54 : vector<8x1xf32> to vector<8x8xf32>
    %56 = arith.subf %52, %55 : vector<8x8xf32>
    %57 = math.exp %56 : vector<8x8xf32>
    %cst_21 = arith.constant dense<0.000000e+00> : vector<8xf32>
    %58 = vector.multi_reduction <add>, %57, %cst_21 [1] : vector<8x8xf32> to vector<8xf32>
    %59 = vector.shape_cast %58 : vector<8xf32> to vector<8x1xf32>
    %60 = tpu.reciprocal %59 {approx = true} : vector<8x1xf32> -> vector<8x1xf32>
    %61 = vector.broadcast %60 : vector<8x1xf32> to vector<8x8xf32>
    %62 = arith.mulf %57, %61 : vector<8x8xf32>
    %63 = arith.truncf %62 : vector<8x8xf32> to vector<8x8xbf16>
    %64 = vector.extract_strided_slice %43 {offsets = [0, 0], sizes = [8, 8], strides = [1, 1]} : vector<8x32xbf16> to vector<8x8xbf16>
    %cst_22 = arith.constant dense<0.000000e+00> : vector<8x8xf32>
    %65 = tpu.matmul %63, %64, %cst_22 {dimension_numbers = #tpu.dot_dimension_numbers<[1], [0], [0], [1], [0, 0, 1, 1], [], []>} : vector<8x8xbf16>, vector<8x8xbf16>, vector<8x8xf32> -> vector<8x8xf32>
    %66 = arith.truncf %65 : vector<8x8xf32> to vector<8x8xbf16>
    %c0_23 = arith.constant 0 : index
    %c0_24 = arith.constant 0 : index
    %67 = vector.load %arg6[%c0_23, %c0_24] : memref<32x32xbf16, #tpu.memory_space<vmem>>, vector<8x32xbf16>
    %cst_25 = arith.constant dense<0.000000e+00> : vector<8x32xf32>
    %68 = tpu.matmul %66, %67, %cst_25 {dimension_numbers = #tpu.dot_dimension_numbers<[1], [0], [0], [1], [0, 0, 1, 1], [], []>} : vector<8x8xbf16>, vector<8x32xbf16>, vector<8x32xf32> -> vector<8x32xf32>
    %69 = arith.addf %44, %68 : vector<8x32xf32>
    %70 = vector.extract_strided_slice %40 {offsets = [0, 8], sizes = [8, 8], strides = [1, 1]} : vector<8x32xf32> to vector<8x8xf32>
    %71 = arith.truncf %70 : vector<8x8xf32> to vector<8x8xbf16>
    %72 = vector.extract_strided_slice %42 {offsets = [0, 8], sizes = [8, 8], strides = [1, 1]} : vector<8x32xbf16> to vector<8x8xbf16>
    %cst_26 = arith.constant dense<0.000000e+00> : vector<8x8xf32>
    %73 = tpu.matmul %71, %72, %cst_26 {dimension_numbers = #tpu.dot_dimension_numbers<[1], [1], [0], [0], [0, 0, 1, 0], [], []>} : vector<8x8xbf16>, vector<8x8xbf16>, vector<8x8xf32> -> vector<8x8xf32>
    %cst_27 = arith.constant -1.000000e+09 : f32
    %74 = vector.shape_cast %15 : vector<1x8xi1> to vector<1x8xi1>
    %75 = vector.broadcast %74 : vector<1x8xi1> to vector<8x8xi1>
    %76 = vector.broadcast %cst_27 : f32 to vector<8x8xf32>
    %77 = arith.select %75, %76, %73 : vector<8x8xi1>, vector<8x8xf32>
    %cst_28 = arith.constant dense<0xFF800000> : vector<8xf32>
    %78 = vector.multi_reduction <maximumf>, %77, %cst_28 [1] : vector<8x8xf32> to vector<8xf32>
    %79 = vector.shape_cast %78 : vector<8xf32> to vector<8x1xf32>
    %80 = vector.broadcast %79 : vector<8x1xf32> to vector<8x8xf32>
    %81 = arith.subf %77, %80 : vector<8x8xf32>
    %82 = math.exp %81 : vector<8x8xf32>
    %cst_29 = arith.constant dense<0.000000e+00> : vector<8xf32>
    %83 = vector.multi_reduction <add>, %82, %cst_29 [1] : vector<8x8xf32> to vector<8xf32>
    %84 = vector.shape_cast %83 : vector<8xf32> to vector<8x1xf32>
    %85 = tpu.reciprocal %84 {approx = true} : vector<8x1xf32> -> vector<8x1xf32>
    %86 = vector.broadcast %85 : vector<8x1xf32> to vector<8x8xf32>
    %87 = arith.mulf %82, %86 : vector<8x8xf32>
    %88 = arith.truncf %87 : vector<8x8xf32> to vector<8x8xbf16>
    %89 = vector.extract_strided_slice %43 {offsets = [0, 8], sizes = [8, 8], strides = [1, 1]} : vector<8x32xbf16> to vector<8x8xbf16>
    %cst_30 = arith.constant dense<0.000000e+00> : vector<8x8xf32>
    %90 = tpu.matmul %88, %89, %cst_30 {dimension_numbers = #tpu.dot_dimension_numbers<[1], [0], [0], [1], [0, 0, 1, 1], [], []>} : vector<8x8xbf16>, vector<8x8xbf16>, vector<8x8xf32> -> vector<8x8xf32>
    %91 = arith.truncf %90 : vector<8x8xf32> to vector<8x8xbf16>
    %c8 = arith.constant 8 : index
    %c0_31 = arith.constant 0 : index
    %92 = vector.load %arg6[%c8, %c0_31] : memref<32x32xbf16, #tpu.memory_space<vmem>>, vector<8x32xbf16>
    %cst_32 = arith.constant dense<0.000000e+00> : vector<8x32xf32>
    %93 = tpu.matmul %91, %92, %cst_32 {dimension_numbers = #tpu.dot_dimension_numbers<[1], [0], [0], [1], [0, 0, 1, 1], [], []>} : vector<8x8xbf16>, vector<8x32xbf16>, vector<8x32xf32> -> vector<8x32xf32>
    %94 = arith.addf %69, %93 : vector<8x32xf32>
    %95 = vector.extract_strided_slice %40 {offsets = [0, 16], sizes = [8, 8], strides = [1, 1]} : vector<8x32xf32> to vector<8x8xf32>
    %96 = arith.truncf %95 : vector<8x8xf32> to vector<8x8xbf16>
    %97 = vector.extract_strided_slice %42 {offsets = [0, 16], sizes = [8, 8], strides = [1, 1]} : vector<8x32xbf16> to vector<8x8xbf16>
    %cst_33 = arith.constant dense<0.000000e+00> : vector<8x8xf32>
    %98 = tpu.matmul %96, %97, %cst_33 {dimension_numbers = #tpu.dot_dimension_numbers<[1], [1], [0], [0], [0, 0, 1, 0], [], []>} : vector<8x8xbf16>, vector<8x8xbf16>, vector<8x8xf32> -> vector<8x8xf32>
    %cst_34 = arith.constant -1.000000e+09 : f32
    %99 = vector.shape_cast %15 : vector<1x8xi1> to vector<1x8xi1>
    %100 = vector.broadcast %99 : vector<1x8xi1> to vector<8x8xi1>
    %101 = vector.broadcast %cst_34 : f32 to vector<8x8xf32>
    %102 = arith.select %100, %101, %98 : vector<8x8xi1>, vector<8x8xf32>
    %cst_35 = arith.constant dense<0xFF800000> : vector<8xf32>
    %103 = vector.multi_reduction <maximumf>, %102, %cst_35 [1] : vector<8x8xf32> to vector<8xf32>
    %104 = vector.shape_cast %103 : vector<8xf32> to vector<8x1xf32>
    %105 = vector.broadcast %104 : vector<8x1xf32> to vector<8x8xf32>
    %106 = arith.subf %102, %105 : vector<8x8xf32>
    %107 = math.exp %106 : vector<8x8xf32>
    %cst_36 = arith.constant dense<0.000000e+00> : vector<8xf32>
    %108 = vector.multi_reduction <add>, %107, %cst_36 [1] : vector<8x8xf32> to vector<8xf32>
    %109 = vector.shape_cast %108 : vector<8xf32> to vector<8x1xf32>
    %110 = tpu.reciprocal %109 {approx = true} : vector<8x1xf32> -> vector<8x1xf32>
    %111 = vector.broadcast %110 : vector<8x1xf32> to vector<8x8xf32>
    %112 = arith.mulf %107, %111 : vector<8x8xf32>
    %113 = arith.truncf %112 : vector<8x8xf32> to vector<8x8xbf16>
    %114 = vector.extract_strided_slice %43 {offsets = [0, 16], sizes = [8, 8], strides = [1, 1]} : vector<8x32xbf16> to vector<8x8xbf16>
    %cst_37 = arith.constant dense<0.000000e+00> : vector<8x8xf32>
    %115 = tpu.matmul %113, %114, %cst_37 {dimension_numbers = #tpu.dot_dimension_numbers<[1], [0], [0], [1], [0, 0, 1, 1], [], []>} : vector<8x8xbf16>, vector<8x8xbf16>, vector<8x8xf32> -> vector<8x8xf32>
    %116 = arith.truncf %115 : vector<8x8xf32> to vector<8x8xbf16>
    %c16 = arith.constant 16 : index
    %c0_38 = arith.constant 0 : index
    %117 = vector.load %arg6[%c16, %c0_38] : memref<32x32xbf16, #tpu.memory_space<vmem>>, vector<8x32xbf16>
    %cst_39 = arith.constant dense<0.000000e+00> : vector<8x32xf32>
    %118 = tpu.matmul %116, %117, %cst_39 {dimension_numbers = #tpu.dot_dimension_numbers<[1], [0], [0], [1], [0, 0, 1, 1], [], []>} : vector<8x8xbf16>, vector<8x32xbf16>, vector<8x32xf32> -> vector<8x32xf32>
    %119 = arith.addf %94, %118 : vector<8x32xf32>
    %120 = vector.extract_strided_slice %40 {offsets = [0, 24], sizes = [8, 8], strides = [1, 1]} : vector<8x32xf32> to vector<8x8xf32>
    %121 = arith.truncf %120 : vector<8x8xf32> to vector<8x8xbf16>
    %122 = vector.extract_strided_slice %42 {offsets = [0, 24], sizes = [8, 8], strides = [1, 1]} : vector<8x32xbf16> to vector<8x8xbf16>
    %cst_40 = arith.constant dense<0.000000e+00> : vector<8x8xf32>
    %123 = tpu.matmul %121, %122, %cst_40 {dimension_numbers = #tpu.dot_dimension_numbers<[1], [1], [0], [0], [0, 0, 1, 0], [], []>} : vector<8x8xbf16>, vector<8x8xbf16>, vector<8x8xf32> -> vector<8x8xf32>
    %cst_41 = arith.constant -1.000000e+09 : f32
    %124 = vector.shape_cast %15 : vector<1x8xi1> to vector<1x8xi1>
    %125 = vector.broadcast %124 : vector<1x8xi1> to vector<8x8xi1>
    %126 = vector.broadcast %cst_41 : f32 to vector<8x8xf32>
    %127 = arith.select %125, %126, %123 : vector<8x8xi1>, vector<8x8xf32>
    %cst_42 = arith.constant dense<0xFF800000> : vector<8xf32>
    %128 = vector.multi_reduction <maximumf>, %127, %cst_42 [1] : vector<8x8xf32> to vector<8xf32>
    %129 = vector.shape_cast %128 : vector<8xf32> to vector<8x1xf32>
    %130 = vector.broadcast %129 : vector<8x1xf32> to vector<8x8xf32>
    %131 = arith.subf %127, %130 : vector<8x8xf32>
    %132 = math.exp %131 : vector<8x8xf32>
    %cst_43 = arith.constant dense<0.000000e+00> : vector<8xf32>
    %133 = vector.multi_reduction <add>, %132, %cst_43 [1] : vector<8x8xf32> to vector<8xf32>
    %134 = vector.shape_cast %133 : vector<8xf32> to vector<8x1xf32>
    %135 = tpu.reciprocal %134 {approx = true} : vector<8x1xf32> -> vector<8x1xf32>
    %136 = vector.broadcast %135 : vector<8x1xf32> to vector<8x8xf32>
    %137 = arith.mulf %132, %136 : vector<8x8xf32>
    %138 = arith.truncf %137 : vector<8x8xf32> to vector<8x8xbf16>
    %139 = vector.extract_strided_slice %43 {offsets = [0, 24], sizes = [8, 8], strides = [1, 1]} : vector<8x32xbf16> to vector<8x8xbf16>
    %cst_44 = arith.constant dense<0.000000e+00> : vector<8x8xf32>
    %140 = tpu.matmul %138, %139, %cst_44 {dimension_numbers = #tpu.dot_dimension_numbers<[1], [0], [0], [1], [0, 0, 1, 1], [], []>} : vector<8x8xbf16>, vector<8x8xbf16>, vector<8x8xf32> -> vector<8x8xf32>
    %141 = arith.truncf %140 : vector<8x8xf32> to vector<8x8xbf16>
    %c24 = arith.constant 24 : index
    %c0_45 = arith.constant 0 : index
    %142 = vector.load %arg6[%c24, %c0_45] : memref<32x32xbf16, #tpu.memory_space<vmem>>, vector<8x32xbf16>
    %cst_46 = arith.constant dense<0.000000e+00> : vector<8x32xf32>
    %143 = tpu.matmul %141, %142, %cst_46 {dimension_numbers = #tpu.dot_dimension_numbers<[1], [0], [0], [1], [0, 0, 1, 1], [], []>} : vector<8x8xbf16>, vector<8x32xbf16>, vector<8x32xf32> -> vector<8x32xf32>
    %144 = arith.addf %119, %143 : vector<8x32xf32>
    %145 = arith.addf %11, %144 : vector<8x32xf32>
    %cst_47 = arith.constant dense<0.000000e+00> : vector<8xf32>
    %146 = vector.multi_reduction <add>, %145, %cst_47 [1] : vector<8x32xf32> to vector<8xf32>
    %147 = vector.shape_cast %146 : vector<8xf32> to vector<8x1xf32>
    %cst_48 = arith.constant 3.125000e-02 : f32
    %148 = vector.broadcast %cst_48 : f32 to vector<8x1xf32>
    %149 = arith.mulf %147, %148 : vector<8x1xf32>
    %150 = vector.broadcast %149 : vector<8x1xf32> to vector<8x32xf32>
    %151 = arith.subf %145, %150 : vector<8x32xf32>
    %152 = arith.mulf %151, %151 : vector<8x32xf32>
    %cst_49 = arith.constant dense<0.000000e+00> : vector<8xf32>
    %153 = vector.multi_reduction <add>, %152, %cst_49 [1] : vector<8x32xf32> to vector<8xf32>
    %154 = vector.shape_cast %153 : vector<8xf32> to vector<8x1xf32>
    %cst_50 = arith.constant 0.0322580636 : f32
    %155 = vector.broadcast %cst_50 : f32 to vector<8x1xf32>
    %156 = arith.mulf %154, %155 : vector<8x1xf32>
    %157 = math.sqrt %156 : vector<8x1xf32>
    %158 = vector.broadcast %2 : f32 to vector<8x32xf32>
    %159 = arith.mulf %158, %151 : vector<8x32xf32>
    %cst_51 = arith.constant 9.99999997E-7 : f32
    %160 = vector.broadcast %cst_51 : f32 to vector<8x1xf32>
    %161 = arith.addf %157, %160 : vector<8x1xf32>
    %162 = vector.broadcast %161 : vector<8x1xf32> to vector<8x32xf32>
    %163 = arith.divf %159, %162 : vector<8x32xf32>
    %164 = vector.broadcast %3 : f32 to vector<8x32xf32>
    %165 = arith.addf %163, %164 : vector<8x32xf32>
    %166 = arith.truncf %165 : vector<8x32xf32> to vector<8x32xbf16>
    %c0_52 = arith.constant 0 : index
    %c0_53 = arith.constant 0 : index
    %167 = vector.load %arg7[%c0_52, %c0_53] : memref<32x64xbf16, #tpu.memory_space<vmem>>, vector<32x64xbf16>
    %cst_54 = arith.constant dense<0.000000e+00> : vector<8x64xf32>
    %168 = tpu.matmul %166, %167, %cst_54 {dimension_numbers = #tpu.dot_dimension_numbers<[1], [0], [0], [1], [0, 0, 1, 1], [], []>} : vector<8x32xbf16>, vector<32x64xbf16>, vector<8x64xf32> -> vector<8x64xf32>
    %c0_55 = arith.constant 0 : index
    %c0_56 = arith.constant 0 : index
    %169 = vector.load %arg8[%c0_55, %c0_56] : memref<1x64xf32, #tpu.memory_space<vmem>>, vector<1x64xf32>
    %170 = vector.shape_cast %169 : vector<1x64xf32> to vector<64xf32>
    %171 = vector.shape_cast %170 : vector<64xf32> to vector<1x64xf32>
    %172 = vector.broadcast %171 : vector<1x64xf32> to vector<8x64xf32>
    %173 = arith.addf %168, %172 : vector<8x64xf32>
    %cst_57 = arith.constant 0.000000e+00 : f32
    %174 = vector.broadcast %cst_57 : f32 to vector<8x64xf32>
    %175 = arith.maximumf %173, %174 : vector<8x64xf32>
    %176 = arith.truncf %175 : vector<8x64xf32> to vector<8x64xbf16>
    %c0_58 = arith.constant 0 : index
    %c0_59 = arith.constant 0 : index
    %177 = vector.load %arg9[%c0_58, %c0_59] : memref<64x32xbf16, #tpu.memory_space<vmem>>, vector<64x32xbf16>
    %cst_60 = arith.constant dense<0.000000e+00> : vector<8x32xf32>
    %178 = tpu.matmul %176, %177, %cst_60 {dimension_numbers = #tpu.dot_dimension_numbers<[1], [0], [0], [1], [0, 0, 1, 1], [], []>} : vector<8x64xbf16>, vector<64x32xbf16>, vector<8x32xf32> -> vector<8x32xf32>
    %c0_61 = arith.constant 0 : index
    %c0_62 = arith.constant 0 : index
    %179 = vector.load %arg10[%c0_61, %c0_62] : memref<1x32xf32, #tpu.memory_space<vmem>>, vector<1x32xf32>
    %180 = vector.shape_cast %179 : vector<1x32xf32> to vector<32xf32>
    %181 = vector.shape_cast %180 : vector<32xf32> to vector<1x32xf32>
    %182 = vector.broadcast %181 : vector<1x32xf32> to vector<8x32xf32>
    %183 = arith.addf %178, %182 : vector<8x32xf32>
    %184 = arith.addf %145, %183 : vector<8x32xf32>
    %c0_63 = arith.constant 0 : index
    %c0_64 = arith.constant 0 : index
    %c0_65 = arith.constant 0 : index
    %185 = vector.load %arg12[%c0_63, %c0_64, %c0_65] : memref<1x8x32xf32, #tpu.memory_space<vmem>>, vector<1x8x32xf32>
    %186 = vector.shape_cast %185 : vector<1x8x32xf32> to vector<8x32xf32>
    %187 = vector.shape_cast %184 : vector<8x32xf32> to vector<1x8x32xf32>
    tpu.vector_store %arg12[%c0_63, %c0_64, %c0_65], %187 {strides = array<i32>} : memref<1x8x32xf32, #tpu.memory_space<vmem>>, vector<1x8x32xf32>,
    return
  }
  func.func @transform_0(%arg0: i32, %arg1: i32) -> (i32, i32, i32) {
    %c0_i32 = arith.constant 0 : i32
    %c0_i32_0 = arith.constant 0 : i32
    %c0_i32_1 = arith.constant 0 : i32
    return %arg0, %c0_i32, %c0_i32_0 : i32, i32, i32
  }
  func.func @transform_1(%arg0: i32, %arg1: i32) -> (i32, i32, i32) {
    %c0_i32 = arith.constant 0 : i32
    %c0_i32_0 = arith.constant 0 : i32
    %c0_i32_1 = arith.constant 0 : i32
    return %arg0, %c0_i32, %c0_i32_0 : i32, i32, i32
  }
  func.func @transform_2(%arg0: i32, %arg1: i32) -> (i32, i32) {
    %c0_i32 = arith.constant 0 : i32
    %c0_i32_0 = arith.constant 0 : i32
    %c0_i32_1 = arith.constant 0 : i32
    return %c0_i32, %c0_i32_0 : i32, i32
  }
  func.func @transform_3(%arg0: i32, %arg1: i32) -> (i32, i32) {
    %c0_i32 = arith.constant 0 : i32
    %c0_i32_0 = arith.constant 0 : i32
    %c0_i32_1 = arith.constant 0 : i32
    return %c0_i32, %c0_i32_0 : i32, i32
  }
  func.func @transform_4(%arg0: i32, %arg1: i32) -> (i32, i32) {
    %c0_i32 = arith.constant 0 : i32
    %c0_i32_0 = arith.constant 0 : i32
    %c0_i32_1 = arith.constant 0 : i32
    return %c0_i32, %c0_i32_0 : i32, i32
  }
  func.func @transform_5(%arg0: i32, %arg1: i32) -> (i32, i32) {
    %c0_i32 = arith.constant 0 : i32
    %c0_i32_0 = arith.constant 0 : i32
    %c0_i32_1 = arith.constant 0 : i32
    return %c0_i32, %c0_i32_0 : i32, i32
  }
  func.func @transform_6(%arg0: i32, %arg1: i32) -> (i32, i32) {
    %c0_i32 = arith.constant 0 : i32
    %c0_i32_0 = arith.constant 0 : i32
    %c0_i32_1 = arith.constant 0 : i32
    return %c0_i32, %c0_i32_0 : i32, i32
  }
  func.func @transform_7(%arg0: i32, %arg1: i32) -> (i32, i32) {
    %c0_i32 = arith.constant 0 : i32
    %c0_i32_0 = arith.constant 0 : i32
    %c0_i32_1 = arith.constant 0 : i32
    return %c0_i32, %c0_i32_0 : i32, i32
  }
  func.func @transform_8(%arg0: i32, %arg1: i32) -> (i32, i32) {
    %c0_i32 = arith.constant 0 : i32
    %c0_i32_0 = arith.constant 0 : i32
    %c0_i32_1 = arith.constant 0 : i32
    return %c0_i32, %c0_i32_0 : i32, i32
  }
  func.func @transform_9(%arg0: i32, %arg1: i32) -> i32 {
    %c0_i32 = arith.constant 0 : i32
    %c0_i32_0 = arith.constant 0 : i32
    return %c0_i32 : i32
  }
  func.func @transform_10(%arg0: i32, %arg1: i32) -> (i32, i32, i32) {
    %c0_i32 = arith.constant 0 : i32
    %c0_i32_0 = arith.constant 0 : i32
    return %arg0, %arg1, %c0_i32 : i32, i32, i32
  }
}

</mosaic_0001>

<bundles_post_ra>
// kernel: tpu_custom_call.1
= control target key start
LH: loop header
LB: loop body
LE: loop exit
PB: predicated region body
PF: predicated region fallthrough
CT: control target
= control target key end

     0   :  { %s2574_s0 = inlined_call_operand.vmem [shape: f32[2,8,32], index: 0, kind: input, shape index: {}]   ;;  %s2575_s1 = inlined_call_operand.hbm [shape: s32[2,1,8], index: 1, kind: input, shape index: {}]   ;;  %s2576_s2 = inlined_call_operand.vmem [shape: bf16[32,32], index: 2, kind: input, shape index: {}]   ;;  %s2577_s3 = inlined_call_operand.vmem [shape: bf16[32,64], index: 3, kind: input, shape index: {}]   ;;  %s2578_s4 = inlined_call_operand.hbm [shape: bf16[32,32], index: 4, kind: input, shape index: {}]   ;;  %s2579_s5 = inlined_call_operand.hbm [shape: bf16[32,64], index: 5, kind: input, shape index: {}]   ;;  %s2580_s6 = inlined_call_operand.vmem [shape: f32[1,64], index: 6, kind: input, shape index: {}]   ;;  %s2581_s7 = inlined_call_operand.vmem [shape: bf16[64,32], index: 7, kind: input, shape index: {}]   ;;  %s2582_s8 = inlined_call_operand.vmem [shape: f32[1,32], index: 8, kind: input, shape index: {}]   ;;  %s2583_s9 = inlined_call_operand.vmem [shape: f32[4], index: 9, kind: input, shape index: {}]   ;;  %s2584_s10 = inlined_call_operand.hbm [shape: f32[2,8,32], index: 10, kind: output, shape index: {}]  }
   0x1   :  { %2590 = sst [smem:[#allocation18_spill]] %s2578_s4 }
   0x2   :  { %2591 = sst [smem:[#allocation19_spill]] %s2579_s5 }
   0x3   :  { %2592 = sst [smem:[#allocation20_spill]] %s2583_s9 }
   0x4   :  { %15 = vsyncpa [#allocation4], 0 }
   0x5   :  { %17 = vsyncpa [#allocation4 + $0x1], 0 }
   0x6   :  { %18 = vsyncpa [#allocation8], 0 }
   0x7   :  { %19 = vsyncpa [#allocation6], 0 }
   0x8   :  { %20 = vsyncpa [#allocation5], 0 }
   0x9   :  { %22 = vsyncpa [#allocation5 + $0x1], 0  ;;  %s2195_s13 = smov 0   ;;  %s2197_s14 = smov 0  }
   0xa   :  { %s2199_s15 = smov 0   ;;  %s2201_s16 = smov 0  }
   0xb   :  { %s2203_s17 = smov 0   ;;  %s2205_s18 = smov 0  }
   0xc LB: > { %s1598_s19 = sadd.s32 4294967295, %s2121_s18   ;;  %s1599_s20 = sadd.s32 4294967294, %s2121_s18   ;;  %s2121_s18 = sphi %s2205_s18, %s28_s18   ;;  %s2117_s17 = sphi %s2203_s17, %s2616_s17   ;;  %s2113_s16 = sphi %s2201_s16, %s2615_s16   ;;  %s2109_s15 = sphi %s2199_s15, %s2614_s15   ;;  %s2105_s14 = sphi %s2197_s14, %s2613_s14   ;;  %s2101_s13 = sphi %s2195_s13, %s2612_s13  }
   0xd   : > { %p86_p0 = scmp.ne.s32.totalorder %s2105_s14, %s2101_s13  ;;  %p2229_p1 = scmp.eq.s32.totalorder %s1598_s19, 0 }
   0xe   : > { %p2233_p2 = scmp.eq.s32.totalorder %s1598_s19, 1  ;;  %p286_p3 = scmp.eq.s32.totalorder %s1599_s20, 1 }
   0xf   : > { %s2593_s21 = scalar_select %p2229_p1, 1, 0 }
  0x10   : > { %p2239_p4 = por %p2229_p1, %p86_p0  ;;  %p1600_p5 = scmp.ge.s32.totalorder %s2121_s18, 1 }
  0x11   : > { %p2244_p6 = por %p286_p3, %p86_p0  ;;  %p293_p7 = scmp.lt.s32.totalorder %s2121_s18, 3 }
  0x12   : > { %s2595_s23 = scalar_select %p2239_p4, 1, 0 }
  0x13   : > { %s2596_s24 = scalar_select %p2244_p6, 1, 0 }
  0x14   : > { %p2249_p8 = pnand %p1600_p5, %p293_p7  ;;  %s2123_s26 = smov [#allocation7]  }
  0x15   : > { %2597 = sst [smem:[#allocation16_spill]] %s2596_s24  ;;  %s311_s27 = sshll.u32 %s2123_s26, 4  ;;  %s312_s27 = int_to_ptr.vmem [resolvable:$true] %s311_s27 }
  0x16   : > { %p1810_p9 = pneg %p2249_p8  ;;  %s2124_s29 = smov [#allocation9]  }
  0x17   : > { %s324_s30 = sshll.u32 %s2124_s29, 4  ;;  %s2600_s9 = sld [smem:[#allocation20_spill]]  ;;  %s325_s30 = int_to_ptr.vmem [resolvable:$true] %s324_s30 }
  0x18   : > { %p2258_p11 = pnand %p1810_p9, %p2229_p1  ;;  %s1949_s20 = scalar_lea.vmem %s312_s27, 256 }
  0x19   : > { %p1950_p13 = scmp.ne.s32.totalorder %s312_s27, %s1949_s20  ;;  %p1957_p5 = scmp.lt.s32.totalorder %s312_s27, %s312_s27 }
  0x1a   : > { %p1940_p12 = pneg %p2258_p11  ;;  %p1958_p7 = scmp.lt.s32.totalorder %s1949_s20, %s1949_s20 }
  0x1c   : > { %p1952_p0 = pnand %p1950_p13, %p1940_p12  ;;  %p1959_p9 = por %p1958_p7, %p1957_p5 }
  0x1d   : > { %s347_s19 = sshll.u32 %s2600_s9, 4  ;;  %s2265_s19 = int_to_ptr.vmem [resolvable:$true] %s347_s19 }
  0x1e   : > { %p1953_p3 = pneg %p1952_p0 }
  0x20   : > { %p1960_p10 = pnand %p1959_p9, %p1953_p3 }
  0x22   : > { %1963 = shalt.err (!%p1960_p10)
}
  0x23   : > { %s2125_s26 = smov 64   ;;  %s2126_s29 = smov 4  }
  0x24   : > { %s2601_s4 = sld [smem:[#allocation18_spill]]  ;;  %s1975_s9 = scalar_lea.vmem %s325_s30, 256 }
  0x25   : > { %p1976_p6 = scmp.ne.s32.totalorder %s325_s30, %s1975_s9  ;;  %p1983_p1 = scmp.lt.s32.totalorder %s325_s30, %s325_s30 }
  0x26   : > { %p1984_p4 = scmp.lt.s32.totalorder %s1975_s9, %s1975_s9 }
  0x27   : > { %p1978_p13 = pnand %p1976_p6, %p1940_p12 }
  0x28   : > { %p1985_p5 = por %p1984_p4, %p1983_p1 }
  0x29   : > { %p1979_p0 = pneg %p1978_p13 }
  0x2a   : > { %1813 = dma.hbm_to_vmem [thread:$0]  (!%p2258_p11), %s2601_s4, 256, %s312_s27, [#allocation8], %s2125_s26, %s2125_s26, %s2126_s29  }
  0x2b   : > { %p1986_p3 = pnand %p1985_p5, %p1979_p0 }
  0x2d   : > { %1989 = shalt.err (!%p1986_p3)
}
  0x2e   : > { %s2602_s5 = sld [smem:[#allocation19_spill]]  ;;  %s1990_s27 = scalar_lea.vmem %s2265_s19, 16 }
  0x2f   : > { %p1991_p10 = scmp.ne.s32.totalorder %s2265_s19, %s1990_s27  ;;  %p1998_p1 = scmp.lt.s32.totalorder %s2265_s19, %s2265_s19 }
  0x30   : > { %p1999_p4 = scmp.lt.s32.totalorder %s1990_s27, %s1990_s27 }
  0x31   : > { %p1993_p6 = pnand %p1991_p10, %p1940_p12 }
  0x32   : > { %p2000_p9 = por %p1999_p4, %p1998_p1 }
  0x33   : > { %p1994_p7 = pneg %p1993_p6 }
  0x34   : > { %1816 = dma.hbm_to_vmem [thread:$0]  (!%p2258_p11), %s2602_s5, 256, %s325_s30, [#allocation8], %s2125_s26, %s2125_s26, %s2126_s29  }
  0x35   : > { %p2001_p13 = pnand %p2000_p9, %p1994_p7 }
  0x37   : > { %2004 = shalt.err (!%p2001_p13)
}
  0x38   : > { %s2127_s9 = smov [#allocation10]   ;;  %s40_s24 = sadd.s32 1, %s2117_s17 }
  0x39   : > { %1819 = dma.vmem_to_smem (!%p2258_p11), %s2265_s19, 16, %s2127_s9, [#allocation6]  }
  0x3a   : > { %p80_p12 = scmp.ne.s32.totalorder %s2109_s15, %s2105_s14  ;;  %p42_p0 = scmp.ge.s32.totalorder %s40_s24, 2 }
  0x3b   : > { %p81_p5 = scmp.eq.s32.totalorder %s2121_s18, 0  ;;  %s73_s30 = sadd.s32 1, %s2109_s15 }
  0x3c   : > { %p2302_p3 = por %p2233_p2, %p80_p12  ;;  %s2618_s24 = smov (%p42_p0, %s40_s24), 0 }
  0x3d   : > { %2604 = sst [smem:[#allocation17_spill]] %s2618_s24  ;;  %p1831_p10 = scmp.lt.s32.totalorder %s2121_s18, 2 }
  0x3e   : > { %s365_s26 = sand.u32 1, %s2109_s15   ;;  %s70_s29 = ssub.s32 %s2117_s17, %s2618_s24 }
  0x3f   : > { %p82_p6 = por %p81_p5, %p80_p12  ;;  %p71_p7 = scmp.eq.s32.totalorder %s70_s29, 0 }
  0x40   : > { %s1605_s19 = sshll.u32 %s2117_s17, 4  ;;  %s368_s11 = scalar_lea.vmem [#allocation3], %s365_s26 }
  0x41   : > { %s375_s12 = sshll.u32 %s368_s11, 4  ;;  %s373_s22 = scalar_lea.hbm %s2575_s1, %s1605_s19  ;;  %s376_s12 = int_to_ptr.vmem [resolvable:$true] %s375_s12 }
  0x42   : > { %s2314_s20 = scalar_select %p71_p7, %s2109_s15, %s73_s30  }
  0x43   : > { %p2319_p2 = pnand %p1831_p10, %p82_p6  ;;  %s366_s5 = scalar_lea.sflag [#allocation4], %s365_s26 }
  0x44   : > { %s2018_s24 = scalar_lea.vmem %s376_s12, 16  ;;  %s2128_s29 = smov [#allocation3]  }
  0x45   : > { %p2007_p11 = pneg %p2319_p2  ;;  %p2019_p1 = scmp.ne.s32.totalorder %s376_s12, %s2018_s24 }
  0x46   : > { %s2023_s30 = sshll.u32 %s2128_s29, 4  ;;  %s2024_s30 = int_to_ptr.vmem [resolvable:$false] %s2023_s30 }
  0x47   : > { %p2021_p4 = pnand %p2019_p1, %p2007_p11  ;;  %s2025_s11 = scalar_lea.vmem %s2024_s30, 32 }
  0x48   : > { %p2026_p13 = scmp.lt.s32.totalorder %s376_s12, %s2024_s30  ;;  %p2027_p12 = scmp.lt.s32.totalorder %s2025_s11, %s2018_s24 }
  0x49   : > { %p2022_p9 = pneg %p2021_p4 }
  0x4a   : > { %p2028_p0 = por %p2027_p12, %p2026_p13 }
  0x4c   : > { %p2029_p5 = pnand %p2028_p0, %p2022_p9 }
  0x4e   : > { %2032 = shalt.err (!%p2029_p5)
}
  0x4f   : > { %1823 = dma.hbm_to_vmem [thread:$0]  (!%p2319_p2), %s373_s22, 16, %s376_s12, %s366_s5  }
  0x50   : > { %384 = sbr.rel (%p2249_p8) target bundleno = 3617 (0xe21), region = 60  ;;  %s2330_s26 = sand.u32 (!%p2249_p8), 1, %s2105_s14  }
  0x51   : > { %s387_s19 = scalar_lea.sflag (!%p2249_p8), [#allocation4], %s2330_s26  ;;  %s389_s27 = scalar_lea.vmem (!%p2249_p8), [#allocation3], %s2330_s26 }
  0x52   : > { %p2606_p10 = scmp.ne.s32.totalorder (!%p2249_p8), %s2595_s23, 0 }
  0x55   : > { %2084 = dma.done.wait (%p2606_p10), %s387_s19, 16  }
  0x56   : > { %2086 = vsyncadd (%p2606_p10), %s387_s19, 4294967280  ;;  %p2607_p6 = scmp.ne.s32.totalorder %s2593_s21, 0 }
  0x58   : > { %2088 = dma.done.wait (%p2607_p6), [#allocation8], 512  }
  0x59   : > { %2090 = vsyncadd (%p2607_p6), [#allocation8], 4294966784 }
  0x5a   : > { %2092 = dma.done.wait (%p2607_p6), [#allocation6], 16  }
  0x5b   : > { %2094 = vsyncadd (%p2607_p6), [#allocation6], 4294967280 }
  0x5c   : > { %406 = sfence }
  0x5d   : > { %p442_p8 = scmp.lt.s32.totalorder %s2113_s16, 1  ;;  %vm456_vm0 = vcmask 261120   ;;  %v1899_v12 = vld [vmem:[%s2577_s3 + $0x8] sm:$0xff]   ;;  %v2129_v14 = vmov 0.0   ;;  %v1900_v15 = vld [vmem:[%s2577_s3] sm:$0xff]   ;;  %vm2130_vm1 = vmmov 0   ;;  %v685_v62 = vlaneseq }
  0x5e   : > { %v1901_v13 = vld [vmem:[%s2576_s2 + $0x8] sm:$0xff]   ;;  %1686 = vmatprep.subr.bf16.mxu0 %v2129_v14  ;;  %1694 = vmatprep.subr.bf16.mxu1 %v2129_v14  ;;  %v1902_v16 = vld [vmem:[%s2576_s2] sm:$0xff]   ;;  %vm542_vm6 = vcmask 519168   ;;  %vm637_vm7 = vcmask 64512   ;;  %s2131_s23 = smov 120   ;;  %s2134_s25 = smov 88  }
  0x5f   : > { %s443_s4 = scalar_select %p442_p8, %s2113_s16, 1  ;;  %1687 = vmatpush3.bf16.msra.mxu0 %v1899_v12  ;;  %1695 = vmatpush3.bf16.msra.mxu1 %v1901_v13  ;;  %v547_v63 = vld [vmem:[%s389_s27] sm:$0x1]  ;;  %vm711_vm10 = vcmask 1043456   ;;  %vm1416_vm13 = vcmask 523264  }
  0x60   : > { %1688 = vmatprep.subr.bf16.mxu0 %v2129_v14  ;;  %1690 = vmatprep.mubr.msk.bf16.mxu0 %vm2130_vm1, %v2129_v14  ;;  %vm548_vm8 = vcmp.eq.s32.totalorder %v547_v63, 0  ;;  %s2133_s27 = smov 96   ;;  %s2136_s21 = smov 80  }
  0x61   : > { %s1611_s5 = sshll.u32 %s443_s4, 3  ;;  %1696 = vmatprep.subr.bf16.mxu1 %v2129_v14  ;;  %1698 = vmatprep.mubr.msk.bf16.mxu1 %vm2130_vm1, %v2129_v14  ;;  %s447_s4 = sld [smem:[#allocation10]] }
  0x62   : > { %s445_s24 = scalar_lea.vmem %s2574_s0, %s1611_s5  ;;  %s1612_s5 = sld [smem:[#allocation10 + $0x1]] }
  0x63   : > { %v2351_v0 = vld [vmem:[%s445_s24] sm:$0xff]  ;;  %1689 = vmatpush3.bf16.msra.mxu0 %v1900_v15  ;;  %1697 = vmatpush3.bf16.msra.mxu1 %v1902_v16  ;;  %s2135_s24 = smov 112   ;;  %s2137_s12 = smov 104  }
  0x64   : > { %v457_v1 = vsel %vm456_vm0, %v2351_v0, 0.0  ;;  %1702 = vmatprep.subr.bf16.mxu0 %v2129_v14  ;;  %1708 = vmatprep.subr.bf16.mxu1 %v2129_v14  ;;  %s2138_s9 = smov 72   ;;  %s1613_s19 = sld [smem:[#allocation10 + $0x2]] }
  0x65   : > { %458 = vadd.xlane.f32.xlu0 %v457_v1  ;;  %s1645_s29 = sshll.u32 %s2113_s16, 7  ;;  %s1463_s16 = scalar_lea.sflag [#allocation5], %s2330_s26 }
  0x67   : > { %v474_v33 = vstv %s447_s4  ;;  %s1614_s4 = sld [smem:[#allocation10 + $0x3]] }
  0x68   : > { %v479_v36 = vstv %s1612_s5  ;;  %s2525_s5 = scalar_lea.hbm %s2584_s10, %s1645_s29 }
  0x69   : > { %551 = vadd.xlane.f32.xlu0 %v457_v1  ;;  %v686_v1 = vshrl.u32 %v685_v62, 7 }
  0xee   : > { %v459_v2 = vpop.xlane.xlu0 %458 }
  0xef   : > { %v460_v3 = vmul.f32 0.03125, %v459_v2  ;;  %v687_v2 = vsub.s32 0, %v686_v1 }
  0xf1   : > { %v461_v4 = vsub.f32 %v2351_v0, %v460_v3  ;;  %v2132_v3 = vmov 0  }
  0xf2   : > { %v552_v5 = vpop.xlane.xlu0 %551 }
  0xf3   : > { %v553_v6 = vmul.f32 0.03125, %v552_v5  ;;  %v462_v7 = vmul.f32 %v461_v4, %v461_v4  ;;  %v475_v34 = vmul.f32 %v474_v33, %v461_v4  ;;  %v684_v4 = vsel %vm548_vm8, 1, %v2132_v3 }
  0xf4   : > { %v2406_v5 = vrot.slane %v684_v4, %v687_v2 }
  0xf5   : > { %v554_v8 = vsub.f32 %v2351_v0, %v553_v6  ;;  %v463_v9 = vsel %vm456_vm0, %v462_v7, 0.0 }
  0xf6   : > { %464 = vadd.xlane.f32.xlu1 %v463_v9  ;;  %vm689_vm9 = vcmp.eq.s32.totalorder %v2406_v5, 1 }
  0xf7   : > { %v555_v10 = vmul.f32 %v554_v8, %v554_v8  ;;  %v568_v38 = vmul.f32 %v554_v8, %v474_v33 }
  0xf9   : > { %v556_v11 = vsel %vm456_vm0, %v555_v10, 0.0 }
  0xfa   : > { %557 = vadd.xlane.f32.xlu1 %v556_v11 }
 0x17f   : > { %v465_v17 = vpop.xlane.xlu1 %464 }
 0x180   : > { %v466_v18 = vmul.f32 0.032258064, %v465_v17 }
 0x182   : > { %1910 = vrsqrt.f32 %v466_v18  ;;  %vm469_vm2 = vcmp.eq.f32.partialorder %v466_v18, inf  ;;  %v472_v23 = vand.u32 2147483648, %v466_v18  ;;  %vm471_vm3 = vcmp.eq.f32.partialorder %v466_v18, 0.0 }
 0x183   : > { %v558_v19 = vpop.xlane.xlu1 %557 }
 0x184   : > { %v559_v20 = vmul.f32 0.032258064, %v558_v19 }
 0x186   : > { %1912 = vrsqrt.f32 %v559_v20  ;;  %vm562_vm4 = vcmp.eq.f32.partialorder %v559_v20, inf  ;;  %v565_v29 = vand.u32 2147483648, %v559_v20  ;;  %vm564_vm5 = vcmp.eq.f32.partialorder %v559_v20, 0.0 }
 0x18f   : > { %v1911_v21 = vpop.eup %1910 }
 0x190   : > { %v468_v22 = vmul.f32 %v1911_v21, %v466_v18 }
 0x192   : > { %v470_v24 = vsel %vm469_vm2, %v466_v18, %v468_v22 }
 0x193   : > { %v1913_v25 = vpop.eup %1912  ;;  %v473_v26 = vsel %vm471_vm3, %v472_v23, %v470_v24 }
 0x194   : > { %v476_v27 = vadd.f32 1e-06, %v473_v26  ;;  %v561_v28 = vmul.f32 %v1913_v25, %v559_v20 }
 0x196   : > { %1914 = vrcp.f32 %v476_v27  ;;  %v563_v30 = vsel %vm562_vm4, %v559_v20, %v561_v28 }
 0x197   : > { %v566_v31 = vsel %vm564_vm5, %v565_v29, %v563_v30 }
 0x198   : > { %v569_v32 = vadd.f32 1e-06, %v566_v31 }
 0x19a   : > { %1916 = vrcp.f32 %v569_v32 }
 0x1a3   : > { %v1915_v35 = vpop.eup %1914 }
 0x1a4   : > { %v478_v37 = vmul.f32 %v1915_v35, %v475_v34  ;;  %v870_v35 = vld [vmem:[#allocation7 + $0x4] sm:$0xf] }
 0x1a6   : > { %v480_v39 = vadd.f32 %v479_v36, %v478_v37 }
 0x1a7   : > { %v1917_v40 = vpop.eup %1916 }
 0x1a8   : > { %v481_v41 = vpack.c.bf16 %v480_v39, %v480_v39  ;;  %v571_v42 = vmul.f32 %v1917_v40, %v568_v38 }
 0x1aa   : > { %1691 = vmatmul.mubr.msk.bf16.vlgmr.msra.gmra.mxu0 %vm456_vm0, %v481_v41  ;;  %v573_v43 = vadd.f32 %v571_v42, %v479_v36  ;;  %v875_v36 = vsel %vm711_vm10, %v870_v35, 0  ;;  %v756_v41 = vld [vmem:[#allocation7] sm:$0xf] }
 0x1ab   : > { %1704 = vmatprep.mubr.msk.bf16.mxu0 %vm2130_vm1, %v2129_v14 }
 0x1ac   : > { %v574_v44 = vpack.c.bf16 %v573_v43, %v573_v43 }
 0x1ae   : > { %1699 = vmatmul.mubr.msk.bf16.vlgmr.msra.gmra.mxu1 %vm456_vm0, %v574_v44  ;;  %v921_v44 = vsel %vm711_vm10, %v756_v41, 0 }
 0x1af   : > { %1710 = vmatprep.mubr.msk.bf16.mxu1 %vm2130_vm1, %v2129_v14 }
 0x26a   : > { %v535_v45 = vpop.f32.mrf.mxu0 }
 0x26b   : > { %v541_v46 = vpack.c.bf16 %v535_v45, %v535_v45 }
 0x26c   : > { %v1692_v47 = vpop.f32.mrf.mxu0 }
 0x26d   : > { %543 = vst.msk [vmem:[#allocation2] sm:$0xf] %vm542_vm6, %v541_v46 }
 0x26e   : > { %v538_v48 = vpop.f32.mrf.mxu0  ;;  %v628_v49 = vpop.f32.mrf.mxu1 }
 0x26f   : > { %v634_v50 = vmul.f32 0.35355338, %v628_v49 }
 0x270   : > { %v1693_v51 = vpop.f32.mrf.mxu0  ;;  %v1700_v52 = vpop.f32.mrf.mxu1 }
 0x271   : > { %v2387_v53 = vpack.c.bf16 %v634_v50, %v634_v50 }
 0x272   : > { %v631_v54 = vpop.f32.mrf.mxu1 }
 0x273   : > { %758 = vrot.lane.b32.xlu1 %v2387_v53, %s2131_s23 }
 0x274   : > { %v1701_v55 = vpop.f32.mrf.mxu1  ;;  %v635_v56 = vld [vmem:[#allocation2] sm:$0xf] }
 0x275   : > { %v642_v57 = vsel %vm637_vm7, %v635_v56, 0  ;;  %v2391_v58 = vcombine.low %v635_v56, %v635_v56 }
 0x276   : > { %1703 = vmatpush3.bf16.xpose.msra.mxu0 %v642_v57 }
 0x277   : > { %760 = vrot.lane.b32.xlu0 %v2391_v58, %s2131_s23  ;;  %1714 = vmatprep.subr.bf16.mxu0 %v2129_v14 }
 0x27d   : > { %1705 = vmatmul.mubr.msk.bf16.vlgmr.msra.gmra.mxu0 %vm637_vm7, %v2387_v53 }
 0x27e   : > { %1716 = vmatprep.mubr.msk.bf16.mxu0 %vm2130_vm1, %v2129_v14 }
 0x2e5   : > { %v759_v61 = vpop.permute.xlu1 %758 }
 0x2e9   : > { %v761_v59 = vpop.permute.xlu0 %760 }
 0x2ea   : > { %v766_v60 = vsel %vm637_vm7, %v761_v59, 0 }
 0x2eb   : > { %1715 = vmatpush3.bf16.xpose.msra.mxu0 %v766_v60 }
 0x2ec   : > { %1726 = vmatprep.subr.bf16.mxu0 %v2129_v14 }
 0x2f2   : > { %1717 = vmatmul.mubr.msk.bf16.vlgmr.msra.gmra.mxu0 %vm637_vm7, %v759_v61 }
 0x2f3   : > { %1728 = vmatprep.mubr.msk.bf16.mxu0 %vm2130_vm1, %v2129_v14  ;;  %1727 = vmatpush3.bf16.msra.mxu0 %v875_v36 }
 0x2f4   : > { %1738 = vmatprep.subr.bf16.mxu0 %v2129_v14 }
 0x33d   : > { %v678_v6 = vpop.f32.mrf.mxu0 }
 0x33e   : > { %v690_v7 = vsel %vm689_vm9, -1e+09, %v678_v6 }
 0x33f   : > { %v1706_v8 = vpop.f32.mrf.mxu0  ;;  %v691_v9 = vsel %vm637_vm7, %v690_v7, -inf }
 0x340   : > { %692 = vmax.xlane.f32.xlu1 %v691_v9 }
 0x341   : > { %v681_v10 = vpop.f32.mrf.mxu0 }
 0x343   : > { %v1707_v11 = vpop.f32.mrf.mxu0 }
 0x3b2   : > { %v802_v12 = vpop.f32.mrf.mxu0 }
 0x3b3   : > { %v808_v13 = vsel %vm689_vm9, -1e+09, %v802_v12 }
 0x3b4   : > { %v1718_v15 = vpop.f32.mrf.mxu0  ;;  %v809_v16 = vsel %vm637_vm7, %v808_v13, -inf }
 0x3b5   : > { %810 = vmax.xlane.f32.xlu0 %v809_v16 }
 0x3b6   : > { %v805_v17 = vpop.f32.mrf.mxu0 }
 0x3b8   : > { %v1719_v18 = vpop.f32.mrf.mxu0 }
 0x3c9   : > { %v693_v19 = vpop.xlane.xlu1 %692 }
 0x3ca   : > { %v694_v20 = vsub.f32 %v690_v7, %v693_v19 }
 0x3cc   : > { %v695_v21 = vmul.f32 1.442695, %v694_v20 }
 0x3ce   : > { %1918 = vpow2.f32 %v695_v21 }
 0x3db   : > { %v1919_v22 = vpop.eup %1918 }
 0x3dc   : > { %v697_v23 = vsel %vm637_vm7, %v1919_v22, 0.0 }
 0x3dd   : > { %698 = vadd.xlane.f32.xlu0 %v697_v23 }
 0x3f3   : > { %706 = vrot.lane.b32.xlu0 %v2391_v58, %s2133_s27  ;;  %s2139_s27 = smov [#allocation11]  }
 0x43e   : > { %v811_v24 = vpop.xlane.xlu0 %810 }
 0x43f   : > { %v812_v25 = vsub.f32 %v808_v13, %v811_v24 }
 0x441   : > { %v813_v26 = vmul.f32 1.442695, %v812_v25 }
 0x443   : > { %1920 = vpow2.f32 %v813_v26  ;;  %v1075_v26 = vld [vmem:[#allocation7 + $0x8] sm:$0xf] }
 0x450   : > { %v1921_v27 = vpop.eup %1920 }
 0x451   : > { %v815_v28 = vsel %vm637_vm7, %v1921_v27, 0.0 }
 0x452   : > { %816 = vadd.xlane.f32.xlu1 %v815_v28 }
 0x463   : > { %821 = vrot.lane.b32.xlu1 %v2391_v58, %s2134_s25  ;;  %s2037_s25 = sshll.u32 %s2139_s27, 4  ;;  %s2038_s25 = int_to_ptr.vmem [resolvable:$false] %s2037_s25 }
 0x466   : > { %v699_v29 = vpop.xlane.xlu0 %698 }
 0x467   : > { %1922 = vrcp.f32 %v699_v29  ;;  %965 = vrot.lane.b32.xlu1 %v2391_v58, %s2135_s24 }
 0x46a   : > { %v707_v30 = vpop.permute.xlu0 %706 }
 0x46b   : > { %v713_v31 = vsel %vm711_vm10, %v707_v30, 0  ;;  %963 = vrot.lane.b32.xlu1 %v2387_v53, %s2135_s24  ;;  %s2039_s24 = scalar_lea.vmem %s2038_s25, 256 }
 0x46c   : > { %1709 = vmatpush3.bf16.msra.mxu1 %v713_v31 }
 0x46d   : > { %1720 = vmatprep.subr.bf16.mxu1 %v2129_v14 }
 0x474   : > { %v1923_v32 = vpop.eup %1922 }
 0x475   : > { %v701_v33 = vmul.f32 %v1923_v32, %v1919_v22 }
 0x477   : > { %v702_v34 = vpack.c.bf16 %v701_v33, %v701_v33 }
 0x479   : > { %1711 = vmatmul.mubr.msk.bf16.vlgmr.msra.gmra.mxu1 %vm637_vm7, %v702_v34 }
 0x47a   : > { %1722 = vmatprep.mubr.msk.bf16.mxu1 %vm2130_vm1, %v2129_v14 }
 0x4db   : > { %v817_v37 = vpop.xlane.xlu1 %816 }
 0x4dc   : > { %1924 = vrcp.f32 %v817_v37 }
 0x4df   : > { %v822_v38 = vpop.permute.xlu1 %821 }
 0x4e0   : > { %v827_v39 = vsel %vm711_vm10, %v822_v38, 0 }
 0x4e1   : > { %1721 = vmatpush3.bf16.msra.mxu1 %v827_v39 }
 0x4e2   : > { %1732 = vmatprep.subr.bf16.mxu1 %v2129_v14 }
 0x4e3   : > { %v966_v50 = vpop.permute.xlu1 %965 }
 0x4e4   : > { %v971_v55 = vsel %vm637_vm7, %v966_v50, 0 }
 0x4e7   : > { %v964_v59 = vpop.permute.xlu1 %963 }
 0x4e9   : > { %v1925_v40 = vpop.eup %1924 }
 0x4ea   : > { %v819_v42 = vmul.f32 %v1925_v40, %v1921_v27  ;;  %v1080_v27 = vsel %vm711_vm10, %v1075_v26, 0 }
 0x4ec   : > { %v820_v43 = vpack.c.bf16 %v819_v42, %v819_v42 }
 0x4ee   : > { %1723 = vmatmul.mubr.msk.bf16.vlgmr.msra.gmra.mxu1 %vm637_vm7, %v820_v43 }
 0x4ef   : > { %1733 = vmatpush3.bf16.msra.mxu1 %v921_v44  ;;  %1734 = vmatprep.mubr.msk.bf16.mxu1 %vm2130_vm1, %v2129_v14 }
 0x4f0   : > { %1744 = vmatprep.subr.bf16.mxu1 %v2129_v14 }
 0x539   : > { %v749_v45 = vpop.f32.mrf.mxu1 }
 0x53a   : > { %v755_v46 = vpack.c.bf16 %v749_v45, %v749_v45 }
 0x53b   : > { %v1712_v47 = vpop.f32.mrf.mxu1 }
 0x53c   : > { %1735 = vmatmul.mubr.msk.bf16.vlgmr.msra.gmra.mxu1 %vm637_vm7, %v755_v46  ;;  %v1235_v46 = vld [vmem:[#allocation7 + $0xc] sm:$0xf] }
 0x53d   : > { %v752_v48 = vpop.f32.mrf.mxu1  ;;  %1746 = vmatprep.mubr.msk.bf16.mxu1 %vm2130_vm1, %v2129_v14 }
 0x53e   : > { %v1240_v48 = vsel %vm711_vm10, %v1235_v46, 0 }
 0x53f   : > { %v1713_v49 = vpop.f32.mrf.mxu1 }
 0x5ae   : > { %v863_v51 = vpop.f32.mrf.mxu1 }
 0x5af   : > { %v869_v52 = vpack.c.bf16 %v863_v51, %v863_v51 }
 0x5b0   : > { %v1724_v54 = vpop.f32.mrf.mxu1 }
 0x5b1   : > { %1729 = vmatmul.mubr.msk.bf16.vlgmr.msra.gmra.mxu0 %vm637_vm7, %v869_v52 }
 0x5b2   : > { %1739 = vmatpush3.bf16.xpose.msra.mxu0 %v971_v55  ;;  %v866_v56 = vpop.f32.mrf.mxu1  ;;  %1740 = vmatprep.mubr.msk.bf16.mxu0 %vm2130_vm1, %v2129_v14 }
 0x5b3   : > { %1750 = vmatprep.subr.bf16.mxu0 %v2129_v14 }
 0x5b4   : > { %v1725_v57 = vpop.f32.mrf.mxu1 }
 0x5b9   : > { %1741 = vmatmul.mubr.msk.bf16.vlgmr.msra.gmra.mxu0 %vm637_vm7, %v964_v59 }
 0x5ba   : > { %1752 = vmatprep.mubr.msk.bf16.mxu0 %vm2130_vm1, %v2129_v14  ;;  %1751 = vmatpush3.bf16.msra.mxu0 %v1080_v27  ;;  %v1306_v27 = vstv %s1614_s4 }
 0x5bb   : > { %1762 = vmatprep.subr.bf16.mxu0 %v2129_v14 }
 0x5fc   : > { %v2446_v60 = vpop.f32.mrf.mxu1 }
 0x5fe   : > { %v1736_v61 = vpop.f32.mrf.mxu1 }
 0x600   : > { %v960_v62 = vpop.f32.mrf.mxu1 }
 0x602   : > { %v1737_v63 = vpop.f32.mrf.mxu1 }
 0x671   : > { %v2448_v1 = vpop.f32.mrf.mxu0 }
 0x672   : > { %v958_v5 = vadd.f32 %v2446_v60, %v2448_v1 }
 0x673   : > { %v1730_v2 = vpop.f32.mrf.mxu0 }
 0x675   : > { %v914_v3 = vpop.f32.mrf.mxu0 }
 0x677   : > { %v1731_v4 = vpop.f32.mrf.mxu0 }
 0x679   : > { %v1007_v6 = vpop.f32.mrf.mxu0 }
 0x67a   : > { %v1013_v7 = vsel %vm689_vm9, -1e+09, %v1007_v6 }
 0x67b   : > { %v1742_v8 = vpop.f32.mrf.mxu0  ;;  %v1014_v9 = vsel %vm637_vm7, %v1013_v7, -inf }
 0x67c   : > { %1015 = vmax.xlane.f32.xlu0 %v1014_v9 }
 0x67d   : > { %v1010_v10 = vpop.f32.mrf.mxu0 }
 0x67f   : > { %v1743_v11 = vpop.f32.mrf.mxu0 }
 0x692   : > { %1026 = vrot.lane.b32.xlu0 %v2391_v58, %s2136_s21 }
 0x696   : > { %1123 = vrot.lane.b32.xlu0 %v2387_v53, %s2137_s12 }
 0x705   : > { %v1016_v12 = vpop.xlane.xlu0 %1015 }
 0x706   : > { %v1017_v13 = vsub.f32 %v1013_v7, %v1016_v12 }
 0x708   : > { %v1018_v15 = vmul.f32 1.442695, %v1017_v13  ;;  %v1904_v13 = vld [vmem:[#allocation9 + $0x8] sm:$0xff]  }
 0x709   : > { %v1027_v16 = vpop.permute.xlu0 %1026 }
 0x70a   : > { %1926 = vpow2.f32 %v1018_v15  ;;  %v1032_v17 = vsel %vm711_vm10, %v1027_v16, 0  ;;  %v1905_v15 = vld [vmem:[#allocation9] sm:$0xff]  }
 0x70b   : > { %1745 = vmatpush3.bf16.msra.mxu1 %v1032_v17  ;;  %v1907_v16 = vld [vmem:[%s2581_s7 + $0x10] sm:$0xff]  }
 0x70c   : > { %1756 = vmatprep.subr.bf16.mxu1 %v2129_v14 }
 0x70d   : > { %v1124_v25 = vpop.permute.xlu0 %1123 }
 0x717   : > { %v1927_v18 = vpop.eup %1926 }
 0x718   : > { %v1020_v19 = vsel %vm637_vm7, %v1927_v18, 0.0 }
 0x719   : > { %1021 = vadd.xlane.f32.xlu1 %v1020_v19 }
 0x72a   : > { %1125 = vrot.lane.b32.xlu1 %v2391_v58, %s2137_s12  ;;  %s1610_s12 = sshll.u32 %s2330_s26, 3 }
 0x72b   : > { %s441_s30 = scalar_lea.vmem [#allocation11], %s1610_s12 }
 0x72c   : > { %s1477_s11 = sshll.u32 %s441_s30, 4  ;;  %s2527_s11 = int_to_ptr.vmem [resolvable:$true] %s1477_s11 }
 0x72d   : > { %s2033_s23 = scalar_lea.vmem %s2527_s11, 128  ;;  %p2040_p1 = scmp.lt.s32.totalorder %s2527_s11, %s2038_s25 }
 0x72e   : > { %p2034_p7 = scmp.ne.s32.totalorder %s2527_s11, %s2033_s23  ;;  %p2041_p4 = scmp.lt.s32.totalorder %s2039_s24, %s2033_s23 }
 0x730   : > { %p2035_p2 = pnand %p2034_p7, %p2302_p3  ;;  %p2042_p9 = por %p2041_p4, %p2040_p1 }
 0x732   : > { %p2036_p11 = pneg %p2035_p2 }
 0x734   : > { %p2043_p13 = pnand %p2042_p9, %p2036_p11 }
 0x7a2   : > { %v1022_v20 = vpop.xlane.xlu1 %1021 }
 0x7a3   : > { %1928 = vrcp.f32 %v1022_v20 }
 0x7a6   : > { %v1126_v22 = vpop.permute.xlu1 %1125 }
 0x7a7   : > { %v1131_v24 = vsel %vm637_vm7, %v1126_v22, 0 }
 0x7b0   : > { %v1929_v21 = vpop.eup %1928 }
 0x7b1   : > { %v1024_v53 = vmul.f32 %v1929_v21, %v1927_v18 }
 0x7b3   : > { %v1025_v23 = vpack.c.bf16 %v1024_v53, %v1024_v53 }
 0x7b5   : > { %1747 = vmatmul.mubr.msk.bf16.vlgmr.msra.gmra.mxu1 %vm637_vm7, %v1025_v23 }
 0x7b6   : > { %1757 = vmatpush3.bf16.xpose.msra.mxu1 %v1131_v24  ;;  %1758 = vmatprep.mubr.msk.bf16.mxu1 %vm2130_vm1, %v2129_v14  ;;  %v1301_v24 = vstv %s1613_s19 }
 0x7b7   : > { %1768 = vmatprep.subr.bf16.mxu1 %v2129_v14 }
 0x7bd   : > { %1759 = vmatmul.mubr.msk.bf16.vlgmr.msra.gmra.mxu1 %vm637_vm7, %v1124_v25 }
 0x7be   : > { %1770 = vmatprep.mubr.msk.bf16.mxu1 %vm2130_vm1, %v2129_v14  ;;  %1769 = vmatpush3.bf16.msra.mxu1 %v1240_v48 }
 0x7bf   : > { %1782 = vmatprep.subr.bf16.mxu1 %v2129_v14 }
 0x875   : > { %v1068_v28 = vpop.f32.mrf.mxu1 }
 0x876   : > { %v1074_v29 = vpack.c.bf16 %v1068_v28, %v1068_v28 }
 0x877   : > { %v1748_v30 = vpop.f32.mrf.mxu1 }
 0x878   : > { %1753 = vmatmul.mubr.msk.bf16.vlgmr.msra.gmra.mxu0 %vm637_vm7, %v1074_v29 }
 0x879   : > { %v1071_v31 = vpop.f32.mrf.mxu1  ;;  %1764 = vmatprep.mubr.msk.bf16.mxu0 %vm2130_vm1, %v2129_v14 }
 0x87a   : > { %v1908_v31 = vld [vmem:[%s2581_s7 + $0x8] sm:$0xff]  }
 0x87b   : > { %v1749_v32 = vpop.f32.mrf.mxu1 }
 0x87c   : > { %v1909_v32 = vld [vmem:[%s2581_s7] sm:$0xff]  }
 0x87d   : > { %v1167_v33 = vpop.f32.mrf.mxu1 }
 0x87e   : > { %v1173_v34 = vsel %vm689_vm9, -1e+09, %v1167_v33  ;;  %v1634_v33 = vld [vmem:[%s2580_s6] ss:$0 sm:$0xff] }
 0x87f   : > { %v1760_v35 = vpop.f32.mrf.mxu1  ;;  %v1174_v36 = vsel %vm637_vm7, %v1173_v34, -inf }
 0x880   : > { %1175 = vmax.xlane.f32.xlu1 %v1174_v36 }
 0x881   : > { %v1170_v37 = vpop.f32.mrf.mxu1 }
 0x883   : > { %v1761_v38 = vpop.f32.mrf.mxu1 }
 0x909   : > { %v1176_v39 = vpop.xlane.xlu1 %1175 }
 0x90a   : > { %v1177_v40 = vsub.f32 %v1173_v34, %v1176_v39 }
 0x90c   : > { %v1178_v41 = vmul.f32 1.442695, %v1177_v40 }
 0x90e   : > { %1930 = vpow2.f32 %v1178_v41 }
 0x91b   : > { %v1931_v42 = vpop.eup %1930 }
 0x91c   : > { %v1180_v43 = vsel %vm637_vm7, %v1931_v42, 0.0 }
 0x91d   : > { %1181 = vadd.xlane.f32.xlu0 %v1180_v43 }
 0x933   : > { %1186 = vrot.lane.b32.xlu0 %v2391_v58, %s2138_s9 }
 0x938   : > { %v1116_v44 = vpop.f32.mrf.mxu0 }
 0x939   : > { %v1122_v45 = vadd.f32 %v1116_v44, %v958_v5 }
 0x93a   : > { %v1754_v47 = vpop.f32.mrf.mxu0 }
 0x93c   : > { %v1119_v49 = vpop.f32.mrf.mxu0 }
 0x93e   : > { %v1755_v50 = vpop.f32.mrf.mxu0 }
 0x9a6   : > { %v1182_v51 = vpop.xlane.xlu0 %1181 }
 0x9a7   : > { %1932 = vrcp.f32 %v1182_v51 }
 0x9aa   : > { %v1187_v52 = vpop.permute.xlu0 %1186 }
 0x9ab   : > { %v1192_v54 = vsel %vm711_vm10, %v1187_v52, 0 }
 0x9ac   : > { %1763 = vmatpush3.bf16.msra.mxu0 %v1192_v54 }
 0x9ad   : > { %1774 = vmatprep.subr.bf16.mxu0 %v2129_v14 }
 0x9b4   : > { %v1933_v58 = vpop.eup %1932 }
 0x9b5   : > { %v1184_v55 = vmul.f32 %v1933_v58, %v1931_v42 }
 0x9b7   : > { %v1185_v56 = vpack.c.bf16 %v1184_v55, %v1184_v55 }
 0x9b9   : > { %1765 = vmatmul.mubr.msk.bf16.vlgmr.msra.gmra.mxu0 %vm637_vm7, %v1185_v56 }
 0x9ba   : > { %1778 = vmatprep.mubr.msk.bf16.mxu0 %vm2130_vm1, %v2129_v14  ;;  %1775 = vmatpush3.bf16.msra.mxu0 %v1904_v13 }
 0x9bb   : > { %1776 = vmatprep.subr.bf16.mxu0 %v2129_v14 }
 0x9be   : > { %1777 = vmatpush3.bf16.msra.mxu0 %v1905_v15 }
 0xa79   : > { %v1228_v57 = vpop.f32.mrf.mxu0 }
 0xa7a   : > { %v1234_v59 = vpack.c.bf16 %v1228_v57, %v1228_v57 }
 0xa7b   : > { %v1766_v60 = vpop.f32.mrf.mxu0 }
 0xa7c   : > { %1771 = vmatmul.mubr.msk.bf16.vlgmr.msra.gmra.mxu1 %vm637_vm7, %v1234_v59 }
 0xa7d   : > { %v1231_v61 = vpop.f32.mrf.mxu0  ;;  %1790 = vmatprep.mubr.msk.bf16.mxu1 %vm2130_vm1, %v2129_v14 }
 0xa7f   : > { %v1767_v62 = vpop.f32.mrf.mxu0 }
 0xb3c   : > { %v1276_v63 = vpop.f32.mrf.mxu1 }
 0xb3d   : > { %v1282_v1 = vadd.f32 %v1276_v63, %v1122_v45 }
 0xb3e   : > { %v1772_v2 = vpop.f32.mrf.mxu1 }
 0xb3f   : > { %v2490_v3 = vadd.f32 %v1282_v1, %v2351_v0  ;;  %v1906_v0 = vld [vmem:[%s2581_s7 + $0x18] sm:$0xff]  }
 0xb40   : > { %v1279_v4 = vpop.f32.mrf.mxu1  ;;  %1783 = vmatpush3.bf16.msra.mxu1 %v1906_v0 }
 0xb41   : > { %v1284_v6 = vsel %vm456_vm0, %v2490_v3, 0.0  ;;  %1784 = vmatprep.subr.bf16.mxu1 %v2129_v14 }
 0xb42   : > { %1285 = vadd.xlane.f32.xlu1 %v1284_v6  ;;  %v1773_v7 = vpop.f32.mrf.mxu1 }
 0xb44   : > { %1785 = vmatpush3.bf16.msra.mxu1 %v1907_v16 }
 0xb45   : > { %1786 = vmatprep.subr.bf16.mxu1 %v2129_v14 }
 0xb48   : > { %1787 = vmatpush3.bf16.msra.mxu1 %v1908_v31 }
 0xb49   : > { %1788 = vmatprep.subr.bf16.mxu1 %v2129_v14  ;;  %v1638_v14 = vld [vmem:[%s2582_s8] ss:$0 sm:$0xff] }
 0xb4c   : > { %1789 = vmatpush3.bf16.msra.mxu1 %v1909_v32 }
 0xbcb   : > { %v1286_v8 = vpop.xlane.xlu1 %1285 }
 0xbcc   : > { %v1287_v9 = vmul.f32 0.03125, %v1286_v8 }
 0xbce   : > { %v1288_v10 = vsub.f32 %v2490_v3, %v1287_v9 }
 0xbd0   : > { %v1289_v11 = vmul.f32 %v1288_v10, %v1288_v10  ;;  %v1302_v25 = vmul.f32 %v1301_v24, %v1288_v10 }
 0xbd2   : > { %v1290_v12 = vsel %vm456_vm0, %v1289_v11, 0.0 }
 0xbd3   : > { %1291 = vadd.xlane.f32.xlu1 %v1290_v12 }
 0xc5c   : > { %v1292_v17 = vpop.xlane.xlu1 %1291 }
 0xc5d   : > { %v1293_v18 = vmul.f32 0.032258064, %v1292_v17 }
 0xc5f   : > { %1934 = vrsqrt.f32 %v1293_v18  ;;  %vm1296_vm11 = vcmp.eq.f32.partialorder %v1293_v18, inf  ;;  %v1299_v21 = vand.u32 2147483648, %v1293_v18  ;;  %vm1298_vm12 = vcmp.eq.f32.partialorder %v1293_v18, 0.0 }
 0xc6c   : > { %v1935_v19 = vpop.eup %1934 }
 0xc6d   : > { %v1295_v20 = vmul.f32 %v1935_v19, %v1293_v18 }
 0xc6f   : > { %v1297_v53 = vsel %vm1296_vm11, %v1293_v18, %v1295_v20 }
 0xc70   : > { %v1300_v22 = vsel %vm1298_vm12, %v1299_v21, %v1297_v53 }
 0xc71   : > { %v1303_v23 = vadd.f32 1e-06, %v1300_v22 }
 0xc73   : > { %1936 = vrcp.f32 %v1303_v23 }
 0xc80   : > { %v1937_v26 = vpop.eup %1936 }
 0xc81   : > { %v1305_v28 = vmul.f32 %v1937_v26, %v1302_v25 }
 0xc83   : > { %v1307_v29 = vadd.f32 %v1306_v27, %v1305_v28 }
 0xc85   : > { %v1308_v30 = vpack.c.bf16 %v1307_v29, %v1307_v29 }
 0xc87   : > { %1779 = vmatmul.mubr.msk.bf16.vlgmr.msra.gmra.mxu0 %vm456_vm0, %v1308_v30 }
 0xd47   : > { %v1369_v34 = vpop.f32.mrf.mxu0 }
 0xd48   : > { %v1370_v35 = vadd.f32 %v1634_v33, %v1369_v34 }
 0xd49   : > { %v1780_v36 = vpop.f32.mrf.mxu0 }
 0xd4a   : > { %v1375_v37 = vmax.f32 %v1370_v35, 0.0 }
 0xd4b   : > { %v1372_v38 = vpop.f32.mrf.mxu0 }
 0xd4c   : > { %v1376_v39 = vpack.c.bf16 %v1375_v37, %v1375_v37 }
 0xd4d   : > { %v1781_v40 = vpop.f32.mrf.mxu0 }
 0xd4e   : > { %1791 = vmatmul.mubr.msk.bf16.vlgmr.msra.gmra.mxu1 %vm1416_vm13, %v1376_v39 }
 0xe0e   : > { %v1454_v41 = vpop.f32.mrf.mxu1 }
 0xe0f   : > { %v1455_v42 = vadd.f32 %v1638_v14, %v1454_v41 }
 0xe10   : > { %v1792_v43 = vpop.f32.mrf.mxu1 }
 0xe11   : > { %v1460_v5 = vadd.f32 %v1455_v42, %v2490_v3 }
 0xe12   : > { %v1457_v44 = vpop.f32.mrf.mxu1 }
 0xe13   : > { %1461 = vst.msk [vmem:[%s441_s30] sm:$0xff] %vm456_vm0, %v1460_v5 }
 0xe14   : > { %v1793_v45 = vpop.f32.mrf.mxu1 }
 0xe15   : > { %2046 = shalt.err (!%p2043_p13)
}
 0xe16   : > { %s2047_s21 = scalar_lea.hbm %s2525_s5, 128  ;;  %s2051_s9 = scalar_lea.hbm %s2584_s10, 256 }
 0xe17   : > { %p2048_p12 = scmp.ne.s32.totalorder %s2525_s5, %s2047_s21  ;;  %p2052_p10 = scmp.lt.s32.totalorder %s2525_s5, %s2584_s10 }
 0xe18   : > { %p2053_p6 = scmp.lt.s32.totalorder %s2051_s9, %s2047_s21 }
 0xe19   : > { %p2049_p0 = pnand %p2048_p12, %p2302_p3 }
 0xe1a   : > { %p2054_p8 = por %p2053_p6, %p2052_p10 }
 0xe1b   : > { %p2050_p5 = pneg %p2049_p0 }
 0xe1d   : > { %p2055_p7 = pnand %p2054_p8, %p2050_p5 }
 0xe1f   : > { %2058 = shalt.err (!%p2055_p7)
}
 0xe20   : > { %1808 = dma.vmem_to_hbm [thread:$0]  (%p2302_p3), %s2527_s11, 128, %s2525_s5, %s1463_s16  }
 0xe21 PF: > { %s2608_s30 = sld [smem:[#allocation16_spill]]  ;;  %s1489_s19 = sand.u32 1, %s2101_s13  }
 0xe22   : > { %p2610_p11 = scmp.ge.s32.totalorder %s2121_s18, 2  ;;  %s1490_s4 = scalar_lea.sflag [#allocation5], %s1489_s19 }
 0xe27   : > { %p2609_p2 = scmp.ne.s32.totalorder %s2608_s30, 0 }
 0xe29   : > { %p1825_p1 = pnand %p2610_p11, %p2609_p2 }
 0xe2b   : > { %p1826_p4 = pneg %p1825_p1 }
 0xe2d   : > { %2096 = dma.done.wait (%p1826_p4), %s1490_s4, 128  }
 0xe2e   : > { %2098 = vsyncadd (%p1826_p4), %s1490_s4, 4294967168  ;;  %s28_s18 = sadd.s32 1, %s2121_s18   ;;  %s2611_s28 = sld [smem:[#allocation17_spill]] }
 0xe2f   : > { %p25_p9 = scmp.ge.s32.totalorder %s28_s18, 4   ;;  %s2612_s13 = smov %s2105_s14 }
 0xe30   : > { %s2613_s14 = smov %s2109_s15  ;;  %s2614_s15 = smov %s2314_s20 }
 0xe31   : > { %s2615_s16 = smov %s2117_s17  ;;  %27 = sbr.rel (!%p25_p9) target bundleno = 12 (0xc), region = 126 }
 0xe34   : > { %s2616_s17 = smov %s2611_s28 }
 0xe36   :  { %1495 = vsyncpa [#allocation4], 1 }
 0xe37   :  { %1497 = vsyncpa [#allocation4 + $0x1], 1 }
 0xe38   :  { %1498 = vsyncpa [#allocation8], 1 }
 0xe39   :  { %1499 = vsyncpa [#allocation5], 1 }
 0xe3a   :  { %1501 = vsyncpa [#allocation5 + $0x1], 1 }
 0xe3b   :  { %1502 = vsyncpa [#allocation6], 1 }
 0xe3c   :  { %1504 = vsyncpa [#allocation6 + $0x1], 1 }

</bundles_post_ra>
